<compile_context>
chip_gen: v7x
topology: tpu7x:2x2x1
jax: 0.10.0
libtpu: 0.0.40
codegen_flags: <defaults>
</compile_context>

<pallas_src>
import functools

import jax
import jax.numpy as jnp
from jax.experimental import pallas as pl
from jax.experimental.pallas import tpu as pltpu

INPUT_SIZE = 784
HIDDEN_DIM = 256
OUTPUT_SIZE = 10
BN_EPS = 1e-5

H2 = HIDDEN_DIM * 2            # 512
OUT_PAD = 128                  # 10 -> 128 so output stores are lane-dense
TILE_B = 1024                  # batch tile (review: 256 -> 1024)
STAT_ROWS = 8                  # sublane-aligned rows for per-tile (sum, sumsq)
VMEM_LIMIT = 32 * 1024 * 1024  # leaves headroom on v7x's 64 MiB per-TC VMEM


def _round_up(n, m):
    return ((n + m - 1) // m) * m


def _pick_tile(batch):
    # multiple of 16 (bf16 packs 16 sublanes/vreg), capped at TILE_B
    return min(TILE_B, _round_up(max(batch, 1), 16))


def _const_spec(shape):
    nd = len(shape)
    return pl.BlockSpec(shape, lambda i, _nd=nd: (0,) * _nd)


# ----------------------------- Pallas kernels ------------------------------

def _mlp_kernel(x_ref, w1_ref, b1_ref, w2_ref, b2_ref, w3_ref, b3_ref, o_ref):
    """use_batch_norm=False: fc1(+b) -> relu -> fc2(+b) -> relu -> fc3(+b).
    One batch tile per grid step; weights VMEM-resident; bf16 MXU, f32 accum."""
    x = x_ref[...].astype(jnp.bfloat16)
    h1 = jnp.dot(x, w1_ref[...], preferred_element_type=jnp.float32) + b1_ref[...]
    h1 = jnp.maximum(h1, 0.0).astype(jnp.bfloat16)
    h2 = jnp.dot(h1, w2_ref[...], preferred_element_type=jnp.float32) + b2_ref[...]
    h2 = jnp.maximum(h2, 0.0).astype(jnp.bfloat16)
    out = jnp.dot(h2, w3_ref[...], preferred_element_type=jnp.float32) + b3_ref[...]
    o_ref[...] = out.astype(o_ref.dtype)


def _masked_tile_stats(h, batch, need_mask):
    """(sum, sumsq) over the batch axis of an f32 tile, excluding rows beyond the
    true batch size (partial last tile). Returns an (STAT_ROWS, F) slab."""
    if need_mask:
        tile_b = h.shape[0]
        rows = (pl.program_id(0) * tile_b
                + jax.lax.broadcasted_iota(jnp.int32, (tile_b, 1), 0))
        h = jnp.where(rows < batch, h, 0.0)
    s = jnp.sum(h, axis=0, keepdims=True)
    ss = jnp.sum(h * h, axis=0, keepdims=True)
    pad = jnp.zeros((STAT_ROWS - 2, h.shape[1]), jnp.float32)
    return jnp.concatenate([s, ss, pad], axis=0)


def _fc1_stats_kernel(batch, need_mask, x_ref, w1_ref, h1_ref, st_ref):
    """BN pass 1: h1 = x @ w1 (no bias), plus per-tile sum / sumsq of h1."""
    x = x_ref[...].astype(jnp.bfloat16)
    h1 = jnp.dot(x, w1_ref[...], preferred_element_type=jnp.float32)
    h1_ref[...] = h1
    st_ref[...] = _masked_tile_stats(h1, batch, need_mask)[None]


def _bn_relu_fc2_kernel(batch, need_mask, h1_ref, sc1_ref, sh1_ref, w2_ref,
                        h2_ref, st_ref):
    """BN pass 2: apply folded BN1 (scale/shift) + relu, h2 = a1 @ w2, stats of h2."""
    a1 = jnp.maximum(h1_ref[...] * sc1_ref[...] + sh1_ref[...], 0.0)
    h2 = jnp.dot(a1.astype(jnp.bfloat16), w2_ref[...],
                 preferred_element_type=jnp.float32)
    h2_ref[...] = h2
    st_ref[...] = _masked_tile_stats(h2, batch, need_mask)[None]


def _bn_relu_fc3_kernel(h2_ref, sc2_ref, sh2_ref, w3_ref, b3_ref, o_ref):
    """BN pass 3: apply folded BN2 + relu, logits = a2 @ w3 + b3 (padded to 128)."""
    a2 = jnp.maximum(h2_ref[...] * sc2_ref[...] + sh2_ref[...], 0.0)
    out = jnp.dot(a2.astype(jnp.bfloat16), w3_ref[...],
                  preferred_element_type=jnp.float32) + b3_ref[...]
    o_ref[...] = out.astype(o_ref.dtype)


# ------------------------------ Host wrapper --------------------------------

def prepare_params(params, use_batch_norm):
    """One-time weight prep (bf16 cast, 10->128 output padding). Called once,
    OUTSIDE the per-call jit, so it is not re-executed every forward."""
    prep = {
        "w1": params["w1"].astype(jnp.bfloat16),                       # (784, 512)
        "w2": params["w2"].astype(jnp.bfloat16),                       # (512, 256)
        "w3": jnp.pad(params["w3"],
                      ((0, 0), (0, OUT_PAD - OUTPUT_SIZE))).astype(jnp.bfloat16),
        "b3": jnp.pad(params["b3"],
                      ((0, 0), (0, OUT_PAD - OUTPUT_SIZE))).astype(jnp.float32),
    }
    if use_batch_norm:
        for k in ("gamma1", "beta1", "gamma2", "beta2"):
            prep[k] = params[k].astype(jnp.float32)
    else:
        prep["b1"] = params["b1"].astype(jnp.float32)
        prep["b2"] = params["b2"].astype(jnp.float32)
    return prep


def _fold_bn(gamma, beta, stats, batch):
    """Combine per-tile (sum, sumsq) partial stats into folded BN scale/shift.
    Biased variance (training-mode BatchNorm1d), f32 throughout."""
    s = jnp.sum(stats[:, 0, :], axis=0)
    ss = jnp.sum(stats[:, 1, :], axis=0)
    mean = s / batch
    var = jnp.maximum(ss / batch - mean * mean, 0.0)
    scale = gamma * jax.lax.rsqrt(var + BN_EPS)[None, :]
    shift = beta - mean[None, :] * scale
    return scale, shift


@functools.partial(jax.jit, static_argnames=("use_batch_norm",))
def neural_net_forward(x, prepared, use_batch_norm):
    """Forward pass of NeuralNet. x: anything reshapeable to (-1, 784)."""
    p = prepared
    x2d = x.reshape(-1, INPUT_SIZE).astype(jnp.float32)
    batch = x2d.shape[0]
    tile_b = _pick_tile(batch)
    n_tiles = pl.cdiv(batch, tile_b)
    need_mask = (n_tiles * tile_b) != batch
    grid = (n_tiles,)
    cparams = pltpu.CompilerParams(dimension_semantics=("parallel",),
                                   vmem_limit_bytes=VMEM_LIMIT)
    x_spec = pl.BlockSpec((tile_b, INPUT_SIZE), lambda i: (i, 0))

    if not use_batch_norm:
        flops = 2 * batch * (INPUT_SIZE * H2 + H2 * HIDDEN_DIM + HIDDEN_DIM * OUT_PAD)
        bytes_acc = int(x2d.size * 4 + batch * OUT_PAD * 4
                        + sum(int(p[k].size) * p[k].dtype.itemsize
                              for k in ("w1", "b1", "w2", "b2", "w3", "b3")))
        out = pl.pallas_call(
            _mlp_kernel,
            out_shape=jax.ShapeDtypeStruct((batch, OUT_PAD), jnp.float32),
            grid=grid,
            in_specs=[
                x_spec,
                _const_spec((INPUT_SIZE, H2)), _const_spec((1, H2)),
                _const_spec((H2, HIDDEN_DIM)), _const_spec((1, HIDDEN_DIM)),
                _const_spec((HIDDEN_DIM, OUT_PAD)), _const_spec((1, OUT_PAD)),
            ],
            out_specs=pl.BlockSpec((tile_b, OUT_PAD), lambda i: (i, 0)),
            compiler_params=cparams,
            cost_estimate=pl.CostEstimate(flops=flops, transcendentals=0,
                                          bytes_accessed=bytes_acc),
        )(x2d, p["w1"], p["b1"], p["w2"], p["b2"], p["w3"], p["b3"])
        return out[:, :OUTPUT_SIZE]

    # ---- BatchNorm path: three tiled calls, per-batch statistics preserved ----
    h1, st1 = pl.pallas_call(
        functools.partial(_fc1_stats_kernel, batch, need_mask),
        out_shape=(jax.ShapeDtypeStruct((batch, H2), jnp.float32),
                   jax.ShapeDtypeStruct((n_tiles, STAT_ROWS, H2), jnp.float32)),
        grid=grid,
        in_specs=[x_spec, _const_spec((INPUT_SIZE, H2))],
        out_specs=(pl.BlockSpec((tile_b, H2), lambda i: (i, 0)),
                   pl.BlockSpec((1, STAT_ROWS, H2), lambda i: (i, 0, 0))),
        compiler_params=cparams,
    )(x2d, p["w1"])
    scale1, shift1 = _fold_bn(p["gamma1"], p["beta1"], st1, batch)

    h2, st2 = pl.pallas_call(
        functools.partial(_bn_relu_fc2_kernel, batch, need_mask),
        out_shape=(jax.ShapeDtypeStruct((batch, HIDDEN_DIM), jnp.float32),
                   jax.ShapeDtypeStruct((n_tiles, STAT_ROWS, HIDDEN_DIM), jnp.float32)),
        grid=grid,
        in_specs=[pl.BlockSpec((tile_b, H2), lambda i: (i, 0)),
                  _const_spec((1, H2)), _const_spec((1, H2)),
                  _const_spec((H2, HIDDEN_DIM))],
        out_specs=(pl.BlockSpec((tile_b, HIDDEN_DIM), lambda i: (i, 0)),
                   pl.BlockSpec((1, STAT_ROWS, HIDDEN_DIM), lambda i: (i, 0, 0))),
        compiler_params=cparams,
    )(h1, scale1, shift1, p["w2"])
    scale2, shift2 = _fold_bn(p["gamma2"], p["beta2"], st2, batch)

    out = pl.pallas_call(
        _bn_relu_fc3_kernel,
        out_shape=jax.ShapeDtypeStruct((batch, OUT_PAD), jnp.float32),
        grid=grid,
        in_specs=[pl.BlockSpec((tile_b, HIDDEN_DIM), lambda i: (i, 0)),
                  _const_spec((1, HIDDEN_DIM)), _const_spec((1, HIDDEN_DIM)),
                  _const_spec((HIDDEN_DIM, OUT_PAD)), _const_spec((1, OUT_PAD))],
        out_specs=pl.BlockSpec((tile_b, OUT_PAD), lambda i: (i, 0)),
        compiler_params=cparams,
    )(h2, scale2, shift2, p["w3"], p["b3"])
    return out[:, :OUTPUT_SIZE]


# --------------------------- Parameter creation ------------------------------

def init_params(key, use_batch_norm):
    """PyTorch-default-like Linear init: uniform(-1/sqrt(fan_in), 1/sqrt(fan_in)).
    Weights stored f32 as (in_features, out_features)."""
    k = jax.random.split(key, 6)

    def lin_w(kk, fan_in, fan_out):
        bound = 1.0 / jnp.sqrt(fan_in)
        return jax.random.uniform(kk, (fan_in, fan_out), jnp.float32, -bound, bound)

    def lin_b(kk, fan_in, fan_out):
        bound = 1.0 / jnp.sqrt(fan_in)
        return jax.random.uniform(kk, (1, fan_out), jnp.float32, -bound, bound)

    params = {
        "w1": lin_w(k[0], INPUT_SIZE, H2),
        "w2": lin_w(k[1], H2, HIDDEN_DIM),
        "w3": lin_w(k[2], HIDDEN_DIM, OUTPUT_SIZE),
        "b3": lin_b(k[3], HIDDEN_DIM, OUTPUT_SIZE),
    }
    if use_batch_norm:
        params.update({
            "gamma1": jnp.ones((1, H2), jnp.float32),
            "beta1": jnp.zeros((1, H2), jnp.float32),
            "gamma2": jnp.ones((1, HIDDEN_DIM), jnp.float32),
            "beta2": jnp.zeros((1, HIDDEN_DIM), jnp.float32),
        })
    else:
        params.update({
            "b1": lin_b(k[4], INPUT_SIZE, H2),
            "b2": lin_b(k[5], H2, HIDDEN_DIM),
        })
    return params


# ------------------------------ Pure-JAX reference ---------------------------

def reference_forward(x, params, use_batch_norm):
    """Mirrors the kernel's precision choices (bf16 matmul inputs, f32 accum,
    f32 BN statistics, biased variance) so it can be compared tightly."""
    x = x.reshape(-1, INPUT_SIZE).astype(jnp.bfloat16)
    w1 = params["w1"].astype(jnp.bfloat16)
    w2 = params["w2"].astype(jnp.bfloat16)
    w3 = params["w3"].astype(jnp.bfloat16)

    h = jnp.dot(x, w1, preferred_element_type=jnp.float32)
    if use_batch_norm:
        mu = h.mean(0, keepdims=True)
        var = ((h - mu) ** 2).mean(0, keepdims=True)
        h = (h - mu) * jax.lax.rsqrt(var + BN_EPS) * params["gamma1"] + params["beta1"]
    else:
        h = h + params["b1"]
    h = jnp.maximum(h, 0.0).astype(jnp.bfloat16)

    h = jnp.dot(h, w2, preferred_element_type=jnp.float32)
    if use_batch_norm:
        mu = h.mean(0, keepdims=True)
        var = ((h - mu) ** 2).mean(0, keepdims=True)
        h = (h - mu) * jax.lax.rsqrt(var + BN_EPS) * params["gamma2"] + params["beta2"]
    else:
        h = h + params["b2"]
    h = jnp.maximum(h, 0.0).astype(jnp.bfloat16)

    return jnp.dot(h, w3, preferred_element_type=jnp.float32) + params["b3"]


if __name__ == "__main__":
    key = jax.random.PRNGKey(0)
    kx, kp = jax.random.split(key)

    # Small MNIST-like NCHW input; the forward flattens it to (-1, 784).
    batch = 32
    x = jax.random.normal(kx, (batch, 1, 28, 28), jnp.float32)

    ok = True
    for use_bn in (True, False):
        params = init_params(kp, use_bn)
        prepared = prepare_params(params, use_bn)          # one-time weight prep
        out = neural_net_forward(x, prepared, use_batch_norm=use_bn)
        out = jax.block_until_ready(out)
        ref = reference_forward(x, params, use_bn)
        assert out.shape == (batch, OUTPUT_SIZE)
        ok &= bool(jnp.allclose(out, ref, atol=1e-2, rtol=1e-2))

    if ok:
        print("KERNEL_OK")
</pallas_src>

<mosaic_0001>
module attributes {stable_mosaic.version = 11 : i64} {
  func.func @_fc1_stats_kernel(%arg0: i32, %arg1: memref<32x784xf32, #tpu.memory_space<vmem>>, %arg2: memref<784x512xbf16, #tpu.memory_space<vmem>>, %arg3: memref<32x512xf32, #tpu.memory_space<vmem>>, %arg4: memref<1x8x512xf32, #tpu.memory_space<vmem>>) attributes {dimension_semantics = [#tpu.dimension_semantics<parallel>], iteration_bounds = array<i64: 1>, scalar_prefetch = 0 : i64, scratch_operands = 0 : i64, tpu.core_type = #tpu.core_type<tc>, window_params = [{transform_indices = @transform_0, window_bounds = array<i64: 32, 784>}, {pipeline_mode = #tpu.pipeline_mode<synchronous>, transform_indices = @transform_1, window_bounds = array<i64: 784, 512>}, {transform_indices = @transform_2, window_bounds = array<i64: 32, 512>}, {transform_indices = @transform_3, window_bounds = array<i64: 1, 8, 512>}]} {
    %c0 = arith.constant 0 : index
    %c0_0 = arith.constant 0 : index
    %0 = vector.load %arg1[%c0, %c0_0] : memref<32x784xf32, #tpu.memory_space<vmem>>, vector<32x784xf32>
    %1 = arith.truncf %0 : vector<32x784xf32> to vector<32x784xbf16>
    %c0_1 = arith.constant 0 : index
    %c0_2 = arith.constant 0 : index
    %2 = vector.load %arg2[%c0_1, %c0_2] : memref<784x512xbf16, #tpu.memory_space<vmem>>, vector<784x512xbf16>
    %cst = arith.constant dense<0.000000e+00> : vector<32x512xf32>
    %3 = tpu.matmul %1, %2, %cst {dimension_numbers = #tpu.dot_dimension_numbers<[1], [0], [0], [1], [0, 0, 1, 1], [], []>} : vector<32x784xbf16>, vector<784x512xbf16>, vector<32x512xf32> -> vector<32x512xf32>
    %c0_3 = arith.constant 0 : index
    %c0_4 = arith.constant 0 : index
    %4 = vector.load %arg3[%c0_3, %c0_4] : memref<32x512xf32, #tpu.memory_space<vmem>>, vector<32x512xf32>
    tpu.vector_store %arg3[%c0_3, %c0_4], %3 {strides = array<i32>} : memref<32x512xf32, #tpu.memory_space<vmem>>, vector<32x512xf32>,
    %cst_5 = arith.constant dense<0.000000e+00> : vector<512xf32>
    %5 = vector.multi_reduction <add>, %3, %cst_5 [0] : vector<32x512xf32> to vector<512xf32>
    %6 = vector.shape_cast %5 : vector<512xf32> to vector<1x512xf32>
    %7 = arith.mulf %3, %3 : vector<32x512xf32>
    %cst_6 = arith.constant dense<0.000000e+00> : vector<512xf32>
    %8 = vector.multi_reduction <add>, %7, %cst_6 [0] : vector<32x512xf32> to vector<512xf32>
    %9 = vector.shape_cast %8 : vector<512xf32> to vector<1x512xf32>
    %cst_7 = arith.constant 0.000000e+00 : f32
    %10 = vector.broadcast %cst_7 : f32 to vector<6x512xf32>
    %11 = tpu.concatenate %6, %9, %10 in 0 : vector<1x512xf32>, vector<1x512xf32>, vector<6x512xf32> -> vector<8x512xf32>
    %12 = vector.shape_cast %11 : vector<8x512xf32> to vector<1x8x512xf32>
    %c0_8 = arith.constant 0 : index
    %c0_9 = arith.constant 0 : index
    %c0_10 = arith.constant 0 : index
    %13 = vector.load %arg4[%c0_8, %c0_9, %c0_10] : memref<1x8x512xf32, #tpu.memory_space<vmem>>, vector<1x8x512xf32>
    tpu.vector_store %arg4[%c0_8, %c0_9, %c0_10], %12 {strides = array<i32>} : memref<1x8x512xf32, #tpu.memory_space<vmem>>, vector<1x8x512xf32>,
    return
  }
  func.func @transform_0(%arg0: i32) -> (i32, i32) {
    %c0_i32 = arith.constant 0 : i32
    %c0_i32_0 = arith.constant 0 : i32
    return %arg0, %c0_i32 : i32, i32
  }
  func.func @transform_1(%arg0: i32) -> (i32, i32) {
    %c0_i32 = arith.constant 0 : i32
    %c0_i32_0 = arith.constant 0 : i32
    %c0_i32_1 = arith.constant 0 : i32
    return %c0_i32, %c0_i32_0 : i32, i32
  }
  func.func @transform_2(%arg0: i32) -> (i32, i32) {
    %c0_i32 = arith.constant 0 : i32
    %c0_i32_0 = arith.constant 0 : i32
    return %arg0, %c0_i32 : i32, i32
  }
  func.func @transform_3(%arg0: i32) -> (i32, i32, i32) {
    %c0_i32 = arith.constant 0 : i32
    %c0_i32_0 = arith.constant 0 : i32
    %c0_i32_1 = arith.constant 0 : i32
    return %arg0, %c0_i32, %c0_i32_0 : i32, i32, i32
  }
}

module attributes {stable_mosaic.version = 11 : i64} {
  func.func @_bn_relu_fc2_kernel(%arg0: i32, %arg1: memref<32x512xf32, #tpu.memory_space<vmem>>, %arg2: memref<1x512xf32, #tpu.memory_space<vmem>>, %arg3: memref<1x512xf32, #tpu.memory_space<vmem>>, %arg4: memref<512x256xbf16, #tpu.memory_space<vmem>>, %arg5: memref<32x256xf32, #tpu.memory_space<vmem>>, %arg6: memref<1x8x256xf32, #tpu.memory_space<vmem>>) attributes {dimension_semantics = [#tpu.dimension_semantics<parallel>], iteration_bounds = array<i64: 1>, scalar_prefetch = 0 : i64, scratch_operands = 0 : i64, tpu.core_type = #tpu.core_type<tc>, window_params = [{transform_indices = @transform_0, window_bounds = array<i64: 32, 512>}, {pipeline_mode = #tpu.pipeline_mode<synchronous>, transform_indices = @transform_1, window_bounds = array<i64: 1, 512>}, {pipeline_mode = #tpu.pipeline_mode<synchronous>, transform_indices = @transform_2, window_bounds = array<i64: 1, 512>}, {pipeline_mode = #tpu.pipeline_mode<synchronous>, transform_indices = @transform_3, window_bounds = array<i64: 512, 256>}, {transform_indices = @transform_4, window_bounds = array<i64: 32, 256>}, {transform_indices = @transform_5, window_bounds = array<i64: 1, 8, 256>}]} {
    %c0 = arith.constant 0 : index
    %c0_0 = arith.constant 0 : index
    %0 = vector.load %arg1[%c0, %c0_0] : memref<32x512xf32, #tpu.memory_space<vmem>>, vector<32x512xf32>
    %c0_1 = arith.constant 0 : index
    %c0_2 = arith.constant 0 : index
    %1 = vector.load %arg2[%c0_1, %c0_2] : memref<1x512xf32, #tpu.memory_space<vmem>>, vector<1x512xf32>
    %2 = vector.broadcast %1 : vector<1x512xf32> to vector<32x512xf32>
    %3 = arith.mulf %0, %2 : vector<32x512xf32>
    %c0_3 = arith.constant 0 : index
    %c0_4 = arith.constant 0 : index
    %4 = vector.load %arg3[%c0_3, %c0_4] : memref<1x512xf32, #tpu.memory_space<vmem>>, vector<1x512xf32>
    %5 = vector.broadcast %4 : vector<1x512xf32> to vector<32x512xf32>
    %6 = arith.addf %3, %5 : vector<32x512xf32>
    %cst = arith.constant 0.000000e+00 : f32
    %7 = vector.broadcast %cst : f32 to vector<32x512xf32>
    %8 = arith.maximumf %6, %7 : vector<32x512xf32>
    %9 = arith.truncf %8 : vector<32x512xf32> to vector<32x512xbf16>
    %c0_5 = arith.constant 0 : index
    %c0_6 = arith.constant 0 : index
    %10 = vector.load %arg4[%c0_5, %c0_6] : memref<512x256xbf16, #tpu.memory_space<vmem>>, vector<512x256xbf16>
    %cst_7 = arith.constant dense<0.000000e+00> : vector<32x256xf32>
    %11 = tpu.matmul %9, %10, %cst_7 {dimension_numbers = #tpu.dot_dimension_numbers<[1], [0], [0], [1], [0, 0, 1, 1], [], []>} : vector<32x512xbf16>, vector<512x256xbf16>, vector<32x256xf32> -> vector<32x256xf32>
    %c0_8 = arith.constant 0 : index
    %c0_9 = arith.constant 0 : index
    %12 = vector.load %arg5[%c0_8, %c0_9] : memref<32x256xf32, #tpu.memory_space<vmem>>, vector<32x256xf32>
    tpu.vector_store %arg5[%c0_8, %c0_9], %11 {strides = array<i32>} : memref<32x256xf32, #tpu.memory_space<vmem>>, vector<32x256xf32>,
    %cst_10 = arith.constant dense<0.000000e+00> : vector<256xf32>
    %13 = vector.multi_reduction <add>, %11, %cst_10 [0] : vector<32x256xf32> to vector<256xf32>
    %14 = vector.shape_cast %13 : vector<256xf32> to vector<1x256xf32>
    %15 = arith.mulf %11, %11 : vector<32x256xf32>
    %cst_11 = arith.constant dense<0.000000e+00> : vector<256xf32>
    %16 = vector.multi_reduction <add>, %15, %cst_11 [0] : vector<32x256xf32> to vector<256xf32>
    %17 = vector.shape_cast %16 : vector<256xf32> to vector<1x256xf32>
    %cst_12 = arith.constant 0.000000e+00 : f32
    %18 = vector.broadcast %cst_12 : f32 to vector<6x256xf32>
    %19 = tpu.concatenate %14, %17, %18 in 0 : vector<1x256xf32>, vector<1x256xf32>, vector<6x256xf32> -> vector<8x256xf32>
    %20 = vector.shape_cast %19 : vector<8x256xf32> to vector<1x8x256xf32>
    %c0_13 = arith.constant 0 : index
    %c0_14 = arith.constant 0 : index
    %c0_15 = arith.constant 0 : index
    %21 = vector.load %arg6[%c0_13, %c0_14, %c0_15] : memref<1x8x256xf32, #tpu.memory_space<vmem>>, vector<1x8x256xf32>
    tpu.vector_store %arg6[%c0_13, %c0_14, %c0_15], %20 {strides = array<i32>} : memref<1x8x256xf32, #tpu.memory_space<vmem>>, vector<1x8x256xf32>,
    return
  }
  func.func @transform_0(%arg0: i32) -> (i32, i32) {
    %c0_i32 = arith.constant 0 : i32
    %c0_i32_0 = arith.constant 0 : i32
    return %arg0, %c0_i32 : i32, i32
  }
  func.func @transform_1(%arg0: i32) -> (i32, i32) {
    %c0_i32 = arith.constant 0 : i32
    %c0_i32_0 = arith.constant 0 : i32
    %c0_i32_1 = arith.constant 0 : i32
    return %c0_i32, %c0_i32_0 : i32, i32
  }
  func.func @transform_2(%arg0: i32) -> (i32, i32) {
    %c0_i32 = arith.constant 0 : i32
    %c0_i32_0 = arith.constant 0 : i32
    %c0_i32_1 = arith.constant 0 : i32
    return %c0_i32, %c0_i32_0 : i32, i32
  }
  func.func @transform_3(%arg0: i32) -> (i32, i32) {
    %c0_i32 = arith.constant 0 : i32
    %c0_i32_0 = arith.constant 0 : i32
    %c0_i32_1 = arith.constant 0 : i32
    return %c0_i32, %c0_i32_0 : i32, i32
  }
  func.func @transform_4(%arg0: i32) -> (i32, i32) {
    %c0_i32 = arith.constant 0 : i32
    %c0_i32_0 = arith.constant 0 : i32
    return %arg0, %c0_i32 : i32, i32
  }
  func.func @transform_5(%arg0: i32) -> (i32, i32, i32) {
    %c0_i32 = arith.constant 0 : i32
    %c0_i32_0 = arith.constant 0 : i32
    %c0_i32_1 = arith.constant 0 : i32
    return %arg0, %c0_i32, %c0_i32_0 : i32, i32, i32
  }
}

module attributes {stable_mosaic.version = 11 : i64} {
  func.func @_bn_relu_fc3_kernel(%arg0: i32, %arg1: memref<32x256xf32, #tpu.memory_space<vmem>>, %arg2: memref<1x256xf32, #tpu.memory_space<vmem>>, %arg3: memref<1x256xf32, #tpu.memory_space<vmem>>, %arg4: memref<256x128xbf16, #tpu.memory_space<vmem>>, %arg5: memref<1x128xf32, #tpu.memory_space<vmem>>, %arg6: memref<32x128xf32, #tpu.memory_space<vmem>>) attributes {dimension_semantics = [#tpu.dimension_semantics<parallel>], iteration_bounds = array<i64: 1>, scalar_prefetch = 0 : i64, scratch_operands = 0 : i64, tpu.core_type = #tpu.core_type<tc>, window_params = [{transform_indices = @transform_0, window_bounds = array<i64: 32, 256>}, {pipeline_mode = #tpu.pipeline_mode<synchronous>, transform_indices = @transform_1, window_bounds = array<i64: 1, 256>}, {pipeline_mode = #tpu.pipeline_mode<synchronous>, transform_indices = @transform_2, window_bounds = array<i64: 1, 256>}, {pipeline_mode = #tpu.pipeline_mode<synchronous>, transform_indices = @transform_3, window_bounds = array<i64: 256, 128>}, {pipeline_mode = #tpu.pipeline_mode<synchronous>, transform_indices = @transform_4, window_bounds = array<i64: 1, 128>}, {transform_indices = @transform_5, window_bounds = array<i64: 32, 128>}]} {
    %c0 = arith.constant 0 : index
    %c0_0 = arith.constant 0 : index
    %0 = vector.load %arg1[%c0, %c0_0] : memref<32x256xf32, #tpu.memory_space<vmem>>, vector<32x256xf32>
    %c0_1 = arith.constant 0 : index
    %c0_2 = arith.constant 0 : index
    %1 = vector.load %arg2[%c0_1, %c0_2] : memref<1x256xf32, #tpu.memory_space<vmem>>, vector<1x256xf32>
    %2 = vector.broadcast %1 : vector<1x256xf32> to vector<32x256xf32>
    %3 = arith.mulf %0, %2 : vector<32x256xf32>
    %c0_3 = arith.constant 0 : index
    %c0_4 = arith.constant 0 : index
    %4 = vector.load %arg3[%c0_3, %c0_4] : memref<1x256xf32, #tpu.memory_space<vmem>>, vector<1x256xf32>
    %5 = vector.broadcast %4 : vector<1x256xf32> to vector<32x256xf32>
    %6 = arith.addf %3, %5 : vector<32x256xf32>
    %cst = arith.constant 0.000000e+00 : f32
    %7 = vector.broadcast %cst : f32 to vector<32x256xf32>
    %8 = arith.maximumf %6, %7 : vector<32x256xf32>
    %9 = arith.truncf %8 : vector<32x256xf32> to vector<32x256xbf16>
    %c0_5 = arith.constant 0 : index
    %c0_6 = arith.constant 0 : index
    %10 = vector.load %arg4[%c0_5, %c0_6] : memref<256x128xbf16, #tpu.memory_space<vmem>>, vector<256x128xbf16>
    %cst_7 = arith.constant dense<0.000000e+00> : vector<32x128xf32>
    %11 = tpu.matmul %9, %10, %cst_7 {dimension_numbers = #tpu.dot_dimension_numbers<[1], [0], [0], [1], [0, 0, 1, 1], [], []>} : vector<32x256xbf16>, vector<256x128xbf16>, vector<32x128xf32> -> vector<32x128xf32>
    %c0_8 = arith.constant 0 : index
    %c0_9 = arith.constant 0 : index
    %12 = vector.load %arg5[%c0_8, %c0_9] : memref<1x128xf32, #tpu.memory_space<vmem>>, vector<1x128xf32>
    %13 = vector.broadcast %12 : vector<1x128xf32> to vector<32x128xf32>
    %14 = arith.addf %11, %13 : vector<32x128xf32>
    %c0_10 = arith.constant 0 : index
    %c0_11 = arith.constant 0 : index
    %15 = vector.load %arg6[%c0_10, %c0_11] : memref<32x128xf32, #tpu.memory_space<vmem>>, vector<32x128xf32>
    tpu.vector_store %arg6[%c0_10, %c0_11], %14 {strides = array<i32>} : memref<32x128xf32, #tpu.memory_space<vmem>>, vector<32x128xf32>,
    return
  }
  func.func @transform_0(%arg0: i32) -> (i32, i32) {
    %c0_i32 = arith.constant 0 : i32
    %c0_i32_0 = arith.constant 0 : i32
    return %arg0, %c0_i32 : i32, i32
  }
  func.func @transform_1(%arg0: i32) -> (i32, i32) {
    %c0_i32 = arith.constant 0 : i32
    %c0_i32_0 = arith.constant 0 : i32
    %c0_i32_1 = arith.constant 0 : i32
    return %c0_i32, %c0_i32_0 : i32, i32
  }
  func.func @transform_2(%arg0: i32) -> (i32, i32) {
    %c0_i32 = arith.constant 0 : i32
    %c0_i32_0 = arith.constant 0 : i32
    %c0_i32_1 = arith.constant 0 : i32
    return %c0_i32, %c0_i32_0 : i32, i32
  }
  func.func @transform_3(%arg0: i32) -> (i32, i32) {
    %c0_i32 = arith.constant 0 : i32
    %c0_i32_0 = arith.constant 0 : i32
    %c0_i32_1 = arith.constant 0 : i32
    return %c0_i32, %c0_i32_0 : i32, i32
  }
  func.func @transform_4(%arg0: i32) -> (i32, i32) {
    %c0_i32 = arith.constant 0 : i32
    %c0_i32_0 = arith.constant 0 : i32
    %c0_i32_1 = arith.constant 0 : i32
    return %c0_i32, %c0_i32_0 : i32, i32
  }
  func.func @transform_5(%arg0: i32) -> (i32, i32) {
    %c0_i32 = arith.constant 0 : i32
    %c0_i32_0 = arith.constant 0 : i32
    return %arg0, %c0_i32 : i32, i32
  }
}

</mosaic_0001>

<bundles_post_ra>
// kernel: neural_net_forward.5
= control target key start
LH: loop header
LB: loop body
LE: loop exit
PB: predicated region body
PF: predicated region fallthrough
CT: control target
= control target key end

     0   :  { %v31_v5 = vlaneseq  ;;  %s473_s3 = inlined_call_operand.vmem [shape: bf16[256,128], index: 3, kind: input, shape index: {}]   ;;  %s474_s0 = inlined_call_operand.vmem [shape: f32[32,256], index: 0, kind: input, shape index: {}]   ;;  %s475_s1 = inlined_call_operand.vmem [shape: f32[1,256], index: 1, kind: input, shape index: {}]   ;;  %s476_s2 = inlined_call_operand.vmem [shape: f32[1,256], index: 2, kind: input, shape index: {}]   ;;  %s477_s4 = inlined_call_operand.vmem [shape: f32[1,128], index: 4, kind: input, shape index: {}]   ;;  %s478_s5 = inlined_call_operand.vmem [shape: f32[32,128], index: 5, kind: output, shape index: {}]  }
   0x1   :  { %v334_v0 = vld [vmem:[%s473_s3 + $0x40] sm:$0xff]   ;;  %v336_v2 = vld [vmem:[%s473_s3 + $0x48] sm:$0xff]   ;;  %v338_v4 = vld [vmem:[%s473_s3 + $0x50] sm:$0xff]  }
   0x2   :  { %v335_v1 = vld [vmem:[%s473_s3] sm:$0xff]   ;;  %290 = vmatprep.subr.bf16.mxu0 %v334_v0  ;;  %318 = vmatprep.subr.bf16.mxu1 %v334_v0  ;;  %v337_v3 = vld [vmem:[%s473_s3 + $0x8] sm:$0xff]   ;;  %v339_v6 = vld [vmem:[%s473_s3 + $0x10] sm:$0xff]   ;;  %v32_v8 = vshrl.u32 %v31_v5, 7 }
   0x3   :  { %291 = vmatpush3.bf16.msra.mxu0 %v335_v1  ;;  %326 = vmatpush3.bf16.msra.mxu1 %v335_v1  ;;  %v340_v7 = vld [vmem:[%s473_s3 + $0x58] sm:$0xff]   ;;  %v342_v10 = vld [vmem:[%s473_s3 + $0x60] sm:$0xff]   ;;  %v344_v14 = vld [vmem:[%s473_s3 + $0x68] sm:$0xff]  }
   0x4   :  { %292 = vmatprep.subr.bf16.mxu0 %v336_v2  ;;  %319 = vmatprep.subr.bf16.mxu1 %v336_v2  ;;  %v341_v9 = vld [vmem:[%s473_s3 + $0x18] sm:$0xff]   ;;  %v33_v11 = vsub.s32 0, %v32_v8  ;;  %v37_v12 = vsub.s32 1, %v32_v8  ;;  %v343_v13 = vld [vmem:[%s473_s3 + $0x20] sm:$0xff]   ;;  %v22_v15 = vld [vmem:[%s474_s0 + $0x8] sm:$0xff] }
   0x5   :  { %v24_v16 = vld [vmem:[%s474_s0 + $0x18] sm:$0xff]  ;;  %v29_v17 = vld [vmem:[%s475_s1] sm:$0x3]  ;;  %v26_v21 = vld [vmem:[%s474_s0 + $0x28] sm:$0xff] }
   0x6   :  { %v34_v18 = vrot.slane %v29_v17, %v33_v11  ;;  %v38_v19 = vrot.slane %v29_v17, %v37_v12  ;;  %v49_v20 = vld [vmem:[%s476_s2] sm:$0x3]  ;;  %v28_v22 = vld [vmem:[%s474_s0 + $0x38] sm:$0xff]  ;;  %v23_v26 = vld [vmem:[%s474_s0 + $0x10] sm:$0xff] }
   0x7   :  { %293 = vmatpush3.bf16.msra.mxu0 %v337_v3  ;;  %327 = vmatpush3.bf16.msra.mxu1 %v337_v3  ;;  %v54_v23 = vrot.slane %v49_v20, %v33_v11  ;;  %v58_v24 = vrot.slane %v49_v20, %v37_v12  ;;  %v21_v25 = vld [vmem:[%s474_s0] sm:$0xff]  ;;  %v345_v28 = vld [vmem:[%s473_s3 + $0x28] sm:$0xff]   ;;  %v27_v32 = vld [vmem:[%s474_s0 + $0x30] sm:$0xff] }
   0x8   :  { %294 = vmatprep.subr.bf16.mxu0 %v338_v4  ;;  %320 = vmatprep.subr.bf16.mxu1 %v338_v4  ;;  %v25_v27 = vld [vmem:[%s474_s0 + $0x20] sm:$0xff]  ;;  %v42_v29 = vmul.f32 %v38_v19, %v22_v15  ;;  %v44_v30 = vmul.f32 %v38_v19, %v24_v16  ;;  %v46_v31 = vmul.f32 %v38_v19, %v26_v21  ;;  %v346_v33 = vld [vmem:[%s473_s3 + $0x70] sm:$0xff]   ;;  %v348_v50 = vld [vmem:[%s473_s3 + $0x78] sm:$0xff]  }
   0x9   :  { %v48_v34 = vmul.f32 %v38_v19, %v28_v22  ;;  %v41_v35 = vmul.f32 %v34_v18, %v21_v25  ;;  %v43_v36 = vmul.f32 %v34_v18, %v23_v26  ;;  %v45_v40 = vmul.f32 %v34_v18, %v25_v27  ;;  %v347_v45 = vld [vmem:[%s473_s3 + $0x30] sm:$0xff]   ;;  %v349_v59 = vld [vmem:[%s473_s3 + $0x38] sm:$0xff]   ;;  %v273_v0 = vld [vmem:[%s477_s4] ss:$0 sm:$0xff] }
   0xa   :  { %v62_v37 = vadd.f32 %v58_v24, %v42_v29  ;;  %v64_v38 = vadd.f32 %v58_v24, %v44_v30  ;;  %v66_v39 = vadd.f32 %v58_v24, %v46_v31  ;;  %v47_v44 = vmul.f32 %v34_v18, %v27_v32 }
   0xb   :  { %295 = vmatpush3.bf16.msra.mxu0 %v339_v6  ;;  %328 = vmatpush3.bf16.msra.mxu1 %v339_v6  ;;  %v68_v41 = vadd.f32 %v58_v24, %v48_v34  ;;  %v61_v42 = vadd.f32 %v54_v23, %v41_v35  ;;  %v63_v43 = vadd.f32 %v54_v23, %v43_v36 }
   0xc   :  { %296 = vmatprep.subr.bf16.mxu0 %v340_v7  ;;  %321 = vmatprep.subr.bf16.mxu1 %v340_v7  ;;  %v70_v46 = vmax.f32 %v62_v37, 0.0  ;;  %v72_v47 = vmax.f32 %v64_v38, 0.0  ;;  %v74_v48 = vmax.f32 %v66_v39, 0.0  ;;  %v65_v49 = vadd.f32 %v54_v23, %v45_v40 }
   0xd   :  { %v76_v51 = vmax.f32 %v68_v41, 0.0  ;;  %v67_v52 = vadd.f32 %v54_v23, %v47_v44  ;;  %v69_v54 = vmax.f32 %v61_v42, 0.0  ;;  %v71_v56 = vmax.f32 %v63_v43, 0.0 }
   0xe   :  { %v78_v53 = vpack.c.bf16 %v72_v47, %v70_v46  ;;  %v73_v57 = vmax.f32 %v65_v49, 0.0 }
   0xf   :  { %297 = vmatpush3.bf16.msra.mxu0 %v341_v9  ;;  %329 = vmatpush3.bf16.msra.mxu1 %v341_v9  ;;  %v80_v55 = vpack.c.bf16 %v76_v51, %v74_v48  ;;  %v75_v58 = vmax.f32 %v67_v52, 0.0  ;;  %v77_v60 = vpack.c.bf16 %v71_v56, %v69_v54 }
  0x10   :  { %298 = vmatprep.subr.bf16.mxu0 %v342_v10  ;;  %322 = vmatprep.subr.bf16.mxu1 %v342_v10 }
  0x11   :  { %248 = vmatprep.mubr.bf16.mxu0 %v78_v53  ;;  %256 = vmatprep.mubr.bf16.mxu1 %v80_v55  ;;  %v79_v61 = vpack.c.bf16 %v75_v58, %v73_v57 }
  0x13   :  { %299 = vmatpush3.bf16.msra.mxu0 %v343_v13  ;;  %330 = vmatpush3.bf16.msra.mxu1 %v343_v13 }
  0x14   :  { %300 = vmatprep.subr.bf16.mxu0 %v344_v14  ;;  %323 = vmatprep.subr.bf16.mxu1 %v344_v14 }
  0x17   :  { %301 = vmatpush3.bf16.msra.mxu0 %v345_v28  ;;  %331 = vmatpush3.bf16.msra.mxu1 %v345_v28 }
  0x18   :  { %302 = vmatprep.subr.bf16.mxu0 %v346_v33  ;;  %324 = vmatprep.subr.bf16.mxu1 %v346_v33 }
  0x1b   :  { %303 = vmatpush3.bf16.msra.mxu0 %v347_v45  ;;  %332 = vmatpush3.bf16.msra.mxu1 %v347_v45 }
  0x1c   :  { %304 = vmatprep.subr.bf16.mxu0 %v348_v50  ;;  %325 = vmatprep.subr.bf16.mxu1 %v348_v50 }
  0x1f   :  { %305 = vmatpush3.bf16.msra.mxu0 %v349_v59  ;;  %333 = vmatpush3.bf16.msra.mxu1 %v349_v59 }
  0x22   :  { %249 = vmatmul.mubr.bf16.vlgmr.msra.gmra.mrb[0].mxu0 %v77_v60  ;;  %257 = vmatmul.mubr.bf16.vlgmr.msra.gmra.mrb[0].mxu1 %v79_v61 }
  0xf5   :  { %v306_v62 = vpop.f32.mrb[0].mxu0  ;;  %v312_v63 = vpop.f32.mrb[0].mxu1 }
  0xf6   :  { %v307_v1 = vpop.f32.mrb[1].mxu0  ;;  %v313_v2 = vpop.f32.mrb[1].mxu1 }
  0xf7   :  { %v308_v3 = vadd.f32 %v307_v1, %v306_v62  ;;  %v314_v4 = vadd.f32 %v313_v2, %v312_v63  ;;  %v309_v5 = vpop.f32.mrb[2].mxu0  ;;  %v315_v6 = vpop.f32.mrb[2].mxu1 }
  0xf8   :  { %v310_v7 = vpop.f32.mrb[3].mxu0  ;;  %v316_v8 = vpop.f32.mrb[3].mxu1 }
  0xf9   :  { %v251_v9 = vadd.f32 %v308_v3, %v273_v0  ;;  %v259_v10 = vadd.f32 %v314_v4, %v273_v0  ;;  %v311_v11 = vadd.f32 %v310_v7, %v309_v5  ;;  %v317_v12 = vadd.f32 %v316_v8, %v315_v6 }
  0xfb   :  { %265 = vst [vmem:[%s478_s5] sm:$0xff] %v251_v9  ;;  %267 = vst [vmem:[%s478_s5 + $0x10] sm:$0xff] %v259_v10  ;;  %v254_v13 = vadd.f32 %v311_v11, %v273_v0  ;;  %v262_v14 = vadd.f32 %v317_v12, %v273_v0 }
  0xfd   :  { %266 = vst [vmem:[%s478_s5 + $0x8] sm:$0xff] %v254_v13  ;;  %268 = vst [vmem:[%s478_s5 + $0x18] sm:$0xff] %v262_v14 }

// kernel: neural_net_forward.4
= control target key start
LH: loop header
LB: loop body
LE: loop exit
PB: predicated region body
PF: predicated region fallthrough
CT: control target
= control target key end

     0   :  { %v37_v37 = vlaneseq  ;;  %vm677_vm0 = vcmask 1040384   ;;  %vm680_vm1 = vcmask 1041408   ;;  %s1215_s3 = inlined_call_operand.vmem [shape: bf16[512,256], index: 3, kind: input, shape index: {}]   ;;  %s1216_s0 = inlined_call_operand.vmem [shape: f32[32,512], index: 0, kind: input, shape index: {}]   ;;  %s1217_s1 = inlined_call_operand.vmem [shape: f32[1,512], index: 1, kind: input, shape index: {}]   ;;  %s1218_s2 = inlined_call_operand.vmem [shape: f32[1,512], index: 2, kind: input, shape index: {}]   ;;  %s1219_s4 = inlined_call_operand.vmem [shape: f32[32,256], index: 4, kind: output, shape index: {0}]   ;;  %s1220_s5 = inlined_call_operand.vmem [shape: f32[1,8,256], index: 5, kind: output, shape index: {1}]  }
   0x1   :  { %v765_v0 = vld [vmem:[%s1215_s3 + $0x4] ss:$8 sps:$4 sm:$0xff]   ;;  %v769_v2 = vld [vmem:[%s1215_s3] ss:$8 sps:$4 sm:$0xff]   ;;  %v771_v4 = vld [vmem:[%s1215_s3 + $0x14] ss:$8 sps:$4 sm:$0xff]  }
   0x2   :  { %v767_v1 = vld [vmem:[%s1215_s3 + $0x104] ss:$8 sps:$4 sm:$0xff]   ;;  %519 = vmatprep.subr.bf16.mxu1 %v765_v0  ;;  %v770_v3 = vld [vmem:[%s1215_s3 + $0x100] ss:$8 sps:$4 sm:$0xff]   ;;  %v773_v5 = vld [vmem:[%s1215_s3 + $0x114] ss:$8 sps:$4 sm:$0xff]  }
   0x3   :  { %572 = vmatprep.subr.bf16.mxu0 %v767_v1  ;;  %520 = vmatpush1.bf16.msra.mxu1 %v769_v2  ;;  %v775_v6 = vld [vmem:[%s1215_s3 + $0x10] ss:$8 sps:$4 sm:$0xff]   ;;  %v777_v8 = vld [vmem:[%s1215_s3 + $0x24] ss:$8 sps:$4 sm:$0xff]   ;;  %v781_v10 = vld [vmem:[%s1215_s3 + $0x20] ss:$8 sps:$4 sm:$0xff]  }
   0x4   :  { %573 = vmatpush1.bf16.msra.mxu0 %v770_v3  ;;  %521 = vmatprep.subr.bf16.mxu1 %v771_v4  ;;  %v776_v7 = vld [vmem:[%s1215_s3 + $0x110] ss:$8 sps:$4 sm:$0xff]   ;;  %v779_v9 = vld [vmem:[%s1215_s3 + $0x124] ss:$8 sps:$4 sm:$0xff]   ;;  %v782_v11 = vld [vmem:[%s1215_s3 + $0x120] ss:$8 sps:$4 sm:$0xff]  }
   0x5   :  { %574 = vmatprep.subr.bf16.mxu0 %v773_v5  ;;  %v783_v12 = vld [vmem:[%s1215_s3 + $0x34] ss:$8 sps:$4 sm:$0xff]   ;;  %v787_v14 = vld [vmem:[%s1215_s3 + $0x30] ss:$8 sps:$4 sm:$0xff]   ;;  %v789_v16 = vld [vmem:[%s1215_s3 + $0x44] ss:$8 sps:$4 sm:$0xff]  }
   0x6   :  { %v785_v13 = vld [vmem:[%s1215_s3 + $0x134] ss:$8 sps:$4 sm:$0xff]   ;;  %v788_v15 = vld [vmem:[%s1215_s3 + $0x130] ss:$8 sps:$4 sm:$0xff]   ;;  %v791_v17 = vld [vmem:[%s1215_s3 + $0x144] ss:$8 sps:$4 sm:$0xff]  }
   0x7   :  { %522 = vmatpush1.bf16.msra.mxu1 %v775_v6  ;;  %v793_v18 = vld [vmem:[%s1215_s3 + $0x40] ss:$8 sps:$4 sm:$0xff]   ;;  %v795_v20 = vld [vmem:[%s1215_s3 + $0x54] ss:$8 sps:$4 sm:$0xff]   ;;  %v799_v22 = vld [vmem:[%s1215_s3 + $0x50] ss:$8 sps:$4 sm:$0xff]  }
   0x8   :  { %575 = vmatpush1.bf16.msra.mxu0 %v776_v7  ;;  %523 = vmatprep.subr.bf16.mxu1 %v777_v8  ;;  %v794_v19 = vld [vmem:[%s1215_s3 + $0x140] ss:$8 sps:$4 sm:$0xff]   ;;  %v797_v21 = vld [vmem:[%s1215_s3 + $0x154] ss:$8 sps:$4 sm:$0xff]   ;;  %v800_v23 = vld [vmem:[%s1215_s3 + $0x150] ss:$8 sps:$4 sm:$0xff]  }
   0x9   :  { %576 = vmatprep.subr.bf16.mxu0 %v779_v9  ;;  %v801_v24 = vld [vmem:[%s1215_s3 + $0x64] ss:$8 sps:$4 sm:$0xff]   ;;  %v805_v26 = vld [vmem:[%s1215_s3 + $0x60] ss:$8 sps:$4 sm:$0xff]   ;;  %v807_v28 = vld [vmem:[%s1215_s3 + $0x74] ss:$8 sps:$4 sm:$0xff]  }
   0xa   :  { %v803_v25 = vld [vmem:[%s1215_s3 + $0x164] ss:$8 sps:$4 sm:$0xff]   ;;  %v806_v27 = vld [vmem:[%s1215_s3 + $0x160] ss:$8 sps:$4 sm:$0xff]   ;;  %v809_v29 = vld [vmem:[%s1215_s3 + $0x174] ss:$8 sps:$4 sm:$0xff]  }
   0xb   :  { %524 = vmatpush1.bf16.msra.mxu1 %v781_v10  ;;  %v811_v30 = vld [vmem:[%s1215_s3 + $0x70] ss:$8 sps:$4 sm:$0xff]   ;;  %v813_v32 = vld [vmem:[%s1215_s3 + $0x84] ss:$8 sps:$4 sm:$0xff]   ;;  %v817_v34 = vld [vmem:[%s1215_s3 + $0x80] ss:$8 sps:$4 sm:$0xff]  }
   0xc   :  { %577 = vmatpush1.bf16.msra.mxu0 %v782_v11  ;;  %525 = vmatprep.subr.bf16.mxu1 %v783_v12  ;;  %v812_v31 = vld [vmem:[%s1215_s3 + $0x170] ss:$8 sps:$4 sm:$0xff]   ;;  %v815_v33 = vld [vmem:[%s1215_s3 + $0x184] ss:$8 sps:$4 sm:$0xff]   ;;  %v818_v35 = vld [vmem:[%s1215_s3 + $0x180] ss:$8 sps:$4 sm:$0xff]  }
   0xd   :  { %578 = vmatprep.subr.bf16.mxu0 %v785_v13  ;;  %v819_v36 = vld [vmem:[%s1215_s3 + $0x94] ss:$8 sps:$4 sm:$0xff]   ;;  %v823_v39 = vld [vmem:[%s1215_s3 + $0x90] ss:$8 sps:$4 sm:$0xff]   ;;  %v825_v41 = vld [vmem:[%s1215_s3 + $0xa4] ss:$8 sps:$4 sm:$0xff]  }
   0xe   :  { %v821_v38 = vld [vmem:[%s1215_s3 + $0x194] ss:$8 sps:$4 sm:$0xff]   ;;  %v824_v40 = vld [vmem:[%s1215_s3 + $0x190] ss:$8 sps:$4 sm:$0xff]   ;;  %v1014_v42 = vshrl.u32 %v37_v37, 7  ;;  %v20_v53 = vld [vmem:[%s1216_s0 + $0x8] sm:$0xff] }
   0xf   :  { %526 = vmatpush1.bf16.msra.mxu1 %v787_v14  ;;  %v827_v43 = vld [vmem:[%s1215_s3 + $0x1a4] ss:$8 sps:$4 sm:$0xff]   ;;  %v829_v44 = vld [vmem:[%s1215_s3 + $0xa0] ss:$8 sps:$4 sm:$0xff]   ;;  %v831_v46 = vld [vmem:[%s1215_s3 + $0xb4] ss:$8 sps:$4 sm:$0xff]  }
  0x10   :  { %579 = vmatpush1.bf16.msra.mxu0 %v788_v15  ;;  %527 = vmatprep.subr.bf16.mxu1 %v789_v16  ;;  %v830_v45 = vld [vmem:[%s1215_s3 + $0x1a0] ss:$8 sps:$4 sm:$0xff]   ;;  %v43_v47 = vsub.s32 1, %v1014_v42  ;;  %v51_v48 = vsub.s32 3, %v1014_v42  ;;  %v833_v49 = vld [vmem:[%s1215_s3 + $0x1b4] ss:$8 sps:$4 sm:$0xff]  }
  0x11   :  { %580 = vmatprep.subr.bf16.mxu0 %v791_v17  ;;  %v39_v50 = vsub.s32 0, %v1014_v42  ;;  %v835_v51 = vld [vmem:[%s1215_s3 + $0xb0] ss:$8 sps:$4 sm:$0xff]   ;;  %v24_v54 = vld [vmem:[%s1216_s0 + $0x28] sm:$0xff]  ;;  %v35_v55 = vld [vmem:[%s1217_s1] sm:$0xf] }
  0x12   :  { %v836_v52 = vld [vmem:[%s1215_s3 + $0x1b0] ss:$8 sps:$4 sm:$0xff]   ;;  %v73_v56 = vld [vmem:[%s1218_s2] sm:$0xf]  ;;  %v47_v57 = vsub.s32 2, %v1014_v42  ;;  %v44_v58 = vrot.slane %v35_v55, %v43_v47  ;;  %v1061_v62 = vrot.slane %v35_v55, %v51_v48 }
  0x13   :  { %528 = vmatpush1.bf16.msra.mxu1 %v793_v18  ;;  %v1053_v59 = vrot.slane %v73_v56, %v43_v47  ;;  %v22_v60 = vld [vmem:[%s1216_s0 + $0x18] sm:$0xff]  ;;  %v19_v63 = vld [vmem:[%s1216_s0] sm:$0xff]  ;;  %v1072_v2 = vrot.slane %v73_v56, %v51_v48  ;;  %v1074_v3 = vrot.slane %v35_v55, %v39_v50  ;;  %v1082_v10 = vrot.slane %v73_v56, %v39_v50  ;;  %v21_v11 = vld [vmem:[%s1216_s0 + $0x10] sm:$0xff] }
  0x14   :  { %581 = vmatpush1.bf16.msra.mxu0 %v794_v19  ;;  %529 = vmatprep.subr.bf16.mxu1 %v795_v20  ;;  %v26_v61 = vld [vmem:[%s1216_s0 + $0x38] sm:$0xff]  ;;  %v837_v0 = vld [vmem:[%s1215_s3 + $0xc4] ss:$8 sps:$4 sm:$0xff]   ;;  %v58_v4 = vmul.f32 %v44_v58, %v20_v53  ;;  %v62_v5 = vmul.f32 %v44_v58, %v24_v54  ;;  %v60_v6 = vmul.f32 %v1061_v62, %v22_v60  ;;  %v841_v13 = vld [vmem:[%s1215_s3 + $0xc0] ss:$8 sps:$4 sm:$0xff]  }
  0x15   :  { %582 = vmatprep.subr.bf16.mxu0 %v797_v21  ;;  %v839_v1 = vld [vmem:[%s1215_s3 + $0x1c4] ss:$8 sps:$4 sm:$0xff]   ;;  %v64_v7 = vmul.f32 %v1061_v62, %v26_v61  ;;  %v57_v9 = vmul.f32 %v1074_v3, %v19_v63  ;;  %v1087_v12 = vrot.slane %v35_v55, %v47_v57  ;;  %v842_v14 = vld [vmem:[%s1215_s3 + $0x1c0] ss:$8 sps:$4 sm:$0xff]   ;;  %v25_v18 = vld [vmem:[%s1216_s0 + $0x30] sm:$0xff] }
  0x16   :  { %v23_v8 = vld [vmem:[%s1216_s0 + $0x20] sm:$0xff]  ;;  %v96_v15 = vadd.f32 %v1053_v59, %v58_v4  ;;  %v100_v16 = vadd.f32 %v1053_v59, %v62_v5  ;;  %v98_v17 = vadd.f32 %v1072_v2, %v60_v6  ;;  %v843_v19 = vld [vmem:[%s1215_s3 + $0xd4] ss:$8 sps:$4 sm:$0xff]  }
  0x17   :  { %530 = vmatpush1.bf16.msra.mxu1 %v799_v22  ;;  %v845_v20 = vld [vmem:[%s1215_s3 + $0x1d4] ss:$8 sps:$4 sm:$0xff]   ;;  %v102_v21 = vadd.f32 %v1072_v2, %v64_v7  ;;  %v61_v22 = vmul.f32 %v1074_v3, %v23_v8  ;;  %v853_v47 = vld [vmem:[%s1215_s3 + $0xe0] ss:$8 sps:$4 sm:$0xff]  }
  0x18   :  { %583 = vmatpush1.bf16.msra.mxu0 %v800_v23  ;;  %531 = vmatprep.subr.bf16.mxu1 %v801_v24  ;;  %v1109_v23 = vrot.slane %v73_v56, %v47_v57  ;;  %v28_v24 = vld [vmem:[%s1216_s0 + $0x48] sm:$0xff]  ;;  %v34_v37 = vld [vmem:[%s1216_s0 + $0x78] sm:$0xff]  ;;  %v27_v50 = vld [vmem:[%s1216_s0 + $0x40] sm:$0xff] }
  0x19   :  { %584 = vmatprep.subr.bf16.mxu0 %v803_v25  ;;  %v112_v25 = vmax.f32 %v96_v15, 0.0  ;;  %v99_v42 = vadd.f32 %v1082_v10, %v61_v22  ;;  %v854_v48 = vld [vmem:[%s1215_s3 + $0x1e0] ss:$8 sps:$4 sm:$0xff]   ;;  %v29_v55 = vld [vmem:[%s1216_s0 + $0x50] sm:$0xff] }
  0x1a   :  { %v31_v54 = vld [vmem:[%s1216_s0 + $0x60] sm:$0xff]  ;;  %v33_v56 = vld [vmem:[%s1216_s0 + $0x70] sm:$0xff]  ;;  %v67_v5 = vmul.f32 %v1087_v12, %v29_v55 }
  0x1b   :  { %532 = vmatpush1.bf16.msra.mxu1 %v805_v26  ;;  %v116_v26 = vmax.f32 %v100_v16, 0.0  ;;  %v855_v57 = vld [vmem:[%s1215_s3 + $0xf4] ss:$8 sps:$4 sm:$0xff]   ;;  %v115_v61 = vmax.f32 %v99_v42, 0.0  ;;  %v69_v4 = vmul.f32 %v1074_v3, %v31_v54  ;;  %v71_v6 = vmul.f32 %v1087_v12, %v33_v56 }
  0x1c   :  { %585 = vmatpush1.bf16.msra.mxu0 %v806_v27  ;;  %533 = vmatprep.subr.bf16.mxu1 %v807_v28  ;;  %v114_v27 = vmax.f32 %v98_v17, 0.0  ;;  %v59_v28 = vmul.f32 %v1087_v12, %v21_v11 }
  0x1d   :  { %586 = vmatprep.subr.bf16.mxu0 %v809_v29  ;;  %v118_v29 = vmax.f32 %v102_v21, 0.0  ;;  %v107_v15 = vadd.f32 %v1082_v10, %v69_v4  ;;  %v109_v16 = vadd.f32 %v1109_v23, %v71_v6 }
  0x1f   :  { %534 = vmatpush1.bf16.msra.mxu1 %v811_v30  ;;  %v63_v30 = vmul.f32 %v1087_v12, %v25_v18  ;;  %v105_v12 = vadd.f32 %v1109_v23, %v67_v5  ;;  %v125_v22 = vmax.f32 %v109_v16, 0.0 }
  0x20   :  { %587 = vmatpush1.bf16.msra.mxu0 %v812_v31  ;;  %535 = vmatprep.subr.bf16.mxu1 %v813_v32  ;;  %v32_v31 = vld [vmem:[%s1216_s0 + $0x68] sm:$0xff]  ;;  %v30_v32 = vld [vmem:[%s1216_s0 + $0x58] sm:$0xff] }
  0x21   :  { %588 = vmatprep.subr.bf16.mxu0 %v815_v33  ;;  %v847_v33 = vld [vmem:[%s1215_s3 + $0xd0] ss:$8 sps:$4 sm:$0xff]   ;;  %v121_v21 = vmax.f32 %v105_v12, 0.0 }
  0x23   :  { %536 = vmatpush1.bf16.msra.mxu1 %v817_v34  ;;  %v848_v34 = vld [vmem:[%s1215_s3 + $0x1d0] ss:$8 sps:$4 sm:$0xff]  }
  0x24   :  { %589 = vmatpush1.bf16.msra.mxu0 %v818_v35  ;;  %537 = vmatprep.subr.bf16.mxu1 %v819_v36  ;;  %v128_v35 = vpack.c.bf16 %v116_v26, %v112_v25  ;;  %v66_v36 = vmul.f32 %v44_v58, %v28_v24  ;;  %v133_v25 = vpack.c.bf16 %v125_v22, %v121_v21 }
  0x25   :  { %590 = vmatprep.subr.bf16.mxu0 %v821_v38  ;;  %v849_v38 = vld [vmem:[%s1215_s3 + $0xe4] ss:$8 sps:$4 sm:$0xff]  }
  0x26   :  { %551 = vmatprep.mubr.bf16.mxu1 %v128_v35 }
  0x27   :  { %538 = vmatpush1.bf16.msra.mxu1 %v823_v39  ;;  %v851_v39 = vld [vmem:[%s1215_s3 + $0x1e4] ss:$8 sps:$4 sm:$0xff]  }
  0x28   :  { %591 = vmatpush1.bf16.msra.mxu0 %v824_v40  ;;  %539 = vmatprep.subr.bf16.mxu1 %v825_v41  ;;  %v130_v40 = vpack.c.bf16 %v118_v29, %v114_v27  ;;  %v95_v41 = vadd.f32 %v1082_v10, %v57_v9 }
  0x29   :  { %592 = vmatprep.subr.bf16.mxu0 %v827_v43  ;;  %v97_v43 = vadd.f32 %v1109_v23, %v59_v28 }
  0x2a   :  { %604 = vmatprep.mubr.bf16.mxu0 %v130_v40  ;;  %v111_v60 = vmax.f32 %v95_v41, 0.0 }
  0x2b   :  { %540 = vmatpush1.bf16.msra.mxu1 %v829_v44  ;;  %v101_v44 = vadd.f32 %v1109_v23, %v63_v30 }
  0x2c   :  { %593 = vmatpush1.bf16.msra.mxu0 %v830_v45  ;;  %541 = vmatprep.subr.bf16.mxu1 %v831_v46  ;;  %v70_v45 = vmul.f32 %v44_v58, %v32_v31  ;;  %v68_v46 = vmul.f32 %v1061_v62, %v30_v32  ;;  %v857_v58 = vld [vmem:[%s1215_s3 + $0x1f4] ss:$8 sps:$4 sm:$0xff]  }
  0x2d   :  { %594 = vmatprep.subr.bf16.mxu0 %v833_v49  ;;  %v72_v49 = vmul.f32 %v1061_v62, %v34_v37  ;;  %v113_v62 = vmax.f32 %v97_v43, 0.0  ;;  %v117_v63 = vmax.f32 %v101_v44, 0.0 }
  0x2e   :  { %v106_v53 = vadd.f32 %v1072_v2, %v68_v46 }
  0x2f   :  { %542 = vmatpush1.bf16.msra.mxu1 %v835_v51  ;;  %v104_v51 = vadd.f32 %v1053_v59, %v66_v36 }
  0x30   :  { %595 = vmatpush1.bf16.msra.mxu0 %v836_v52  ;;  %543 = vmatprep.subr.bf16.mxu1 %v837_v0  ;;  %v108_v52 = vadd.f32 %v1053_v59, %v70_v45  ;;  %v110_v59 = vadd.f32 %v1072_v2, %v72_v49  ;;  %v859_v0 = vld [vmem:[%s1215_s3 + $0xf0] ss:$8 sps:$4 sm:$0xff]   ;;  %v122_v9 = vmax.f32 %v106_v53, 0.0 }
  0x31   :  { %596 = vmatprep.subr.bf16.mxu0 %v839_v1  ;;  %v65_v1 = vmul.f32 %v1074_v3, %v27_v50  ;;  %v860_v2 = vld [vmem:[%s1215_s3 + $0x1f0] ss:$8 sps:$4 sm:$0xff]   ;;  %v120_v7 = vmax.f32 %v104_v51, 0.0 }
  0x32   :  { %v124_v8 = vmax.f32 %v108_v52, 0.0  ;;  %v126_v11 = vmax.f32 %v110_v59, 0.0 }
  0x33   :  { %544 = vmatpush1.bf16.msra.mxu1 %v841_v13  ;;  %v127_v13 = vpack.c.bf16 %v115_v61, %v111_v60  ;;  %v103_v3 = vadd.f32 %v1082_v10, %v65_v1 }
  0x34   :  { %597 = vmatpush1.bf16.msra.mxu0 %v842_v14  ;;  %545 = vmatprep.subr.bf16.mxu1 %v843_v19  ;;  %v129_v14 = vpack.c.bf16 %v117_v63, %v113_v62  ;;  %v132_v17 = vpack.c.bf16 %v124_v8, %v120_v7  ;;  %v134_v18 = vpack.c.bf16 %v126_v11, %v122_v9 }
  0x35   :  { %598 = vmatprep.subr.bf16.mxu0 %v845_v20  ;;  %v119_v19 = vmax.f32 %v103_v3, 0.0  ;;  %v123_v20 = vmax.f32 %v107_v15, 0.0 }
  0x37   :  { %546 = vmatpush1.bf16.msra.mxu1 %v847_v33  ;;  %v131_v24 = vpack.c.bf16 %v123_v20, %v119_v19 }
  0x38   :  { %599 = vmatpush1.bf16.msra.mxu0 %v848_v34  ;;  %547 = vmatprep.subr.bf16.mxu1 %v849_v38 }
  0x39   :  { %600 = vmatprep.subr.bf16.mxu0 %v851_v39 }
  0x3b   :  { %548 = vmatpush1.bf16.msra.mxu1 %v853_v47 }
  0x3c   :  { %601 = vmatpush1.bf16.msra.mxu0 %v854_v48  ;;  %549 = vmatprep.subr.bf16.mxu1 %v855_v57 }
  0x3d   :  { %602 = vmatprep.subr.bf16.mxu0 %v857_v58 }
  0x3f   :  { %550 = vmatpush1.bf16.msra.mxu1 %v859_v0 }
  0x40   :  { %603 = vmatpush1.bf16.msra.mxu0 %v860_v2 }
  0x42   :  { %552 = vmatmul.mubr.bf16.vlgmr.msra.gmra.mrb[0].mxu1 %v127_v13 }
  0x43   :  { %605 = vmatmul.mubr.bf16.vlgmr.msra.gmra.mrb[0].mxu0 %v129_v14  ;;  %561 = vmatprep.mubr.bf16.mxu1 %v132_v17 }
  0x44   :  { %614 = vmatprep.mubr.bf16.mxu0 %v134_v18 }
  0x4a   :  { %562 = vmatmul.mubr.bf16.gmra.mrb[4].mxu1 %v131_v24 }
  0x4b   :  { %615 = vmatmul.mubr.bf16.gmra.mrb[4].mxu0 %v133_v25 }
 0x115   :  { %v553_v10 = vpop.f32.mrb[0].mxu1 }
 0x116   :  { %v606_v26 = vpop.f32.mrb[0].mxu0  ;;  %v555_v23 = vpop.f32.mrb[1].mxu1 }
 0x117   :  { %v607_v27 = vadd.f32 %v606_v26, %v553_v10  ;;  %v608_v28 = vpop.f32.mrb[1].mxu0  ;;  %v557_v30 = vpop.f32.mrb[2].mxu1 }
 0x118   :  { %v609_v29 = vadd.f32 %v608_v28, %v555_v23  ;;  %v610_v31 = vpop.f32.mrb[2].mxu0  ;;  %v559_v33 = vpop.f32.mrb[3].mxu1 }
 0x119   :  { %625 = vst [vmem:[%s1219_s4] sm:$0xff] %v607_v27  ;;  %v611_v32 = vadd.f32 %v610_v31, %v557_v30  ;;  %v612_v34 = vpop.f32.mrb[3].mxu0  ;;  %v651_v36 = vmul.f32 %v607_v27, %v607_v27 }
 0x11a   :  { %626 = vst [vmem:[%s1219_s4 + $0x8] sm:$0xff] %v609_v29  ;;  %v613_v35 = vadd.f32 %v612_v34, %v559_v33  ;;  %v652_v39 = vmul.f32 %v609_v29, %v609_v29 }
 0x11b   :  { %627 = vst [vmem:[%s1219_s4 + $0x10] sm:$0xff] %v611_v32  ;;  %v633_v37 = vadd.f32 %v611_v32, %v607_v27  ;;  %v653_v38 = vmul.f32 %v611_v32, %v611_v32 }
 0x11c   :  { %628 = vst [vmem:[%s1219_s4 + $0x18] sm:$0xff] %v613_v35  ;;  %v642_v40 = vadd.f32 %v613_v35, %v609_v29  ;;  %v654_v41 = vmul.f32 %v613_v35, %v613_v35 }
 0x11d   :  { %v659_v42 = vadd.f32 %v653_v38, %v651_v36  ;;  %v563_v44 = vpop.f32.mrb[4].mxu1 }
 0x11e   :  { %v668_v43 = vadd.f32 %v654_v41, %v652_v39  ;;  %v616_v45 = vpop.f32.mrb[4].mxu0  ;;  %v565_v47 = vpop.f32.mrb[5].mxu1 }
 0x11f   :  { %v617_v46 = vadd.f32 %v616_v45, %v563_v44  ;;  %v618_v48 = vpop.f32.mrb[5].mxu0  ;;  %v567_v50 = vpop.f32.mrb[6].mxu1 }
 0x120   :  { %v619_v49 = vadd.f32 %v618_v48, %v565_v47  ;;  %v620_v51 = vpop.f32.mrb[6].mxu0  ;;  %v569_v55 = vpop.f32.mrb[7].mxu1 }
 0x121   :  { %629 = vst [vmem:[%s1219_s4 + $0x20] sm:$0xff] %v617_v46  ;;  %v634_v52 = vadd.f32 %v633_v37, %v617_v46  ;;  %v655_v53 = vmul.f32 %v617_v46, %v617_v46  ;;  %v621_v54 = vadd.f32 %v620_v51, %v567_v50  ;;  %v622_v56 = vpop.f32.mrb[7].mxu0 }
 0x122   :  { %630 = vst [vmem:[%s1219_s4 + $0x28] sm:$0xff] %v619_v49  ;;  %v643_v57 = vadd.f32 %v642_v40, %v619_v49  ;;  %v656_v58 = vmul.f32 %v619_v49, %v619_v49  ;;  %v623_v59 = vadd.f32 %v622_v56, %v569_v55 }
 0x123   :  { %v660_v60 = vadd.f32 %v659_v42, %v655_v53  ;;  %631 = vst [vmem:[%s1219_s4 + $0x30] sm:$0xff] %v621_v54  ;;  %v635_v61 = vadd.f32 %v634_v52, %v621_v54  ;;  %v657_v62 = vmul.f32 %v621_v54, %v621_v54 }
 0x124   :  { %v669_v63 = vadd.f32 %v668_v43, %v656_v58  ;;  %632 = vst [vmem:[%s1219_s4 + $0x38] sm:$0xff] %v623_v59  ;;  %v644_v0 = vadd.f32 %v643_v57, %v623_v59  ;;  %v658_v1 = vmul.f32 %v623_v59, %v623_v59 }
 0x125   :  { %v636_v4 = vrot.slane %v635_v61, 4  ;;  %v661_v5 = vadd.f32 %v660_v60, %v657_v62 }
 0x126   :  { %v645_v6 = vrot.slane %v644_v0, 4  ;;  %v670_v2 = vadd.f32 %v669_v63, %v658_v1 }
 0x127   :  { %v637_v7 = vadd.f32 %v636_v4, %v635_v61  ;;  %v662_v8 = vrot.slane %v661_v5, 4 }
 0x128   :  { %v646_v9 = vadd.f32 %v645_v6, %v644_v0  ;;  %v671_v11 = vrot.slane %v670_v2, 4 }
 0x129   :  { %v638_v13 = vrot.slane %v637_v7, 2  ;;  %v663_v14 = vadd.f32 %v662_v8, %v661_v5 }
 0x12a   :  { %v647_v3 = vrot.slane %v646_v9, 2  ;;  %v672_v15 = vadd.f32 %v671_v11, %v670_v2 }
 0x12b   :  { %v639_v12 = vadd.f32 %v638_v13, %v637_v7  ;;  %v664_v16 = vrot.slane %v663_v14, 2 }
 0x12c   :  { %v648_v17 = vadd.f32 %v647_v3, %v646_v9  ;;  %v673_v18 = vrot.slane %v672_v15, 2 }
 0x12d   :  { %v640_v19 = vrot.slane %v639_v12, 1  ;;  %v665_v20 = vadd.f32 %v664_v16, %v663_v14 }
 0x12e   :  { %v649_v21 = vrot.slane %v648_v17, 1  ;;  %v674_v22 = vadd.f32 %v673_v18, %v672_v15 }
 0x12f   :  { %v666_v24 = vrot.slane %v665_v20, 1  ;;  %v641_v10 = vadd.f32 %v640_v19, %v639_v12 }
 0x130   :  { %v675_v25 = vrot.slane %v674_v22, 1  ;;  %v650_v27 = vadd.f32 %v649_v21, %v648_v17 }
 0x131   :  { %v667_v26 = vadd.f32 %v666_v24, %v665_v20 }
 0x132   :  { %v676_v23 = vadd.f32 %v675_v25, %v674_v22 }
 0x133   :  { %v678_v28 = vsel %vm677_vm0, %v641_v10, %v667_v26 }
 0x134   :  { %v681_v29 = vsel %vm680_vm1, %v678_v28, 0.0  ;;  %v679_v30 = vsel %vm677_vm0, %v650_v27, %v676_v23 }
 0x135   :  { %683 = vst [vmem:[%s1220_s5] sm:$0xff] %v681_v29  ;;  %v682_v31 = vsel %vm680_vm1, %v679_v30, 0.0 }
 0x136   :  { %684 = vst [vmem:[%s1220_s5 + $0x8] sm:$0xff] %v682_v31 }

// kernel: neural_net_forward.3
= control target key start
LH: loop header
LB: loop body
LE: loop exit
PB: predicated region body
PF: predicated region fallthrough
CT: control target
= control target key end

     0   :  { %9 = vsyncpa [#allocation3], 0  ;;  %s2374_s12 = smov [#allocation2]   ;;  %s2562_s0 = inlined_call_operand.vmem [shape: f32[32,784], index: 0, kind: input, shape index: {}]   ;;  %s2563_s1 = inlined_call_operand.hbm [shape: bf16[784,512], index: 1, kind: input, shape index: {}]   ;;  %s2564_s2 = inlined_call_operand.vmem [shape: f32[32,512], index: 2, kind: output, shape index: {0}]   ;;  %s2565_s3 = inlined_call_operand.vmem [shape: f32[1,8,512], index: 3, kind: output, shape index: {1}]  }
   0x1   :  { %s17_s13 = sshll.u32 %s2374_s12, 4  ;;  %s2350_s16 = scalar_lea.hbm %s2563_s1, 25088  ;;  %s18_s13 = int_to_ptr.vmem [resolvable:$true] %s17_s13 }
   0x2   :  { %p2351_p0 = scmp.ne.s32.totalorder %s2563_s1, %s2350_s16  ;;  %p2354_p1 = scmp.lt.u32.totalorder %s2350_s16, %s2563_s1 }
   0x4   :  { %p2356_p2 = pnand %p2354_p1, %p2351_p0 }
   0x6   :  { %2359 = shalt.err (!%p2356_p2)
}
   0x7   :  { %s2360_s21 = scalar_lea.vmem %s18_s13, 25088  ;;  %p2365_p4 = scmp.lt.s32.totalorder %s18_s13, %s18_s13 }
   0x8   :  { %p2361_p3 = scmp.ne.s32.totalorder %s18_s13, %s2360_s21  ;;  %p2366_p5 = scmp.lt.s32.totalorder %s2360_s21, %s2360_s21 }
   0xa   :  { %p2367_p6 = por %p2366_p5, %p2365_p4 }
   0xc   :  { %p2368_p7 = pnand %p2367_p6, %p2361_p3 }
   0xe   :  { %2371 = shalt.err (!%p2368_p7)
}
   0xf   :  { %s2375_s22 = smov 256   ;;  %s2376_s23 = smov 16  }
  0x10   :  { %23 = dma.hbm_to_vmem [thread:$0]  %s2563_s1, 25088, %s18_s13, [#allocation3], %s2375_s22, %s2375_s22, %s2376_s23  }
  0x11   :  { %2372 = dma.done.wait [#allocation3], 25088  }
  0x12   :  { %2373 = vsyncadd [#allocation3], 4294942208  ;;  %v2056_v0 = vld [vmem:[#allocation2 + $0x4] ss:$16 sps:$4 sm:$0xff]   ;;  %v2058_v1 = vld [vmem:[#allocation2 + $0xc] ss:$16 sps:$4 sm:$0xff]  }
  0x13   :  { %1253 = vmatprep.subr.bf16.mxu0 %v2056_v0  ;;  %v2060_v2 = vld [vmem:[#allocation2] ss:$16 sps:$4 sm:$0xff]   ;;  %v2061_v3 = vld [vmem:[#allocation2 + $0x8] ss:$16 sps:$4 sm:$0xff]   ;;  %1465 = vmatprep.subr.bf16.mxu1 %v2058_v1  ;;  %v2062_v4 = vld [vmem:[#allocation2 + $0x24] ss:$16 sps:$4 sm:$0xff]  }
  0x14   :  { %1254 = vmatpush1.bf16.msra.mxu0 %v2060_v2  ;;  %1466 = vmatpush1.bf16.msra.mxu1 %v2061_v3  ;;  %v2064_v5 = vld [vmem:[#allocation2 + $0x2c] ss:$16 sps:$4 sm:$0xff]   ;;  %v2066_v6 = vld [vmem:[#allocation2 + $0x20] ss:$16 sps:$4 sm:$0xff]   ;;  %v2067_v7 = vld [vmem:[#allocation2 + $0x28] ss:$16 sps:$4 sm:$0xff]  }
  0x15   :  { %1255 = vmatprep.subr.bf16.mxu0 %v2062_v4  ;;  %1467 = vmatprep.subr.bf16.mxu1 %v2064_v5  ;;  %v2068_v8 = vld [vmem:[#allocation2 + $0x44] ss:$16 sps:$4 sm:$0xff]   ;;  %v2070_v9 = vld [vmem:[#allocation2 + $0x4c] ss:$16 sps:$4 sm:$0xff]   ;;  %v2072_v10 = vld [vmem:[#allocation2 + $0x40] ss:$16 sps:$4 sm:$0xff]  }
  0x16   :  { %v2073_v11 = vld [vmem:[#allocation2 + $0x48] ss:$16 sps:$4 sm:$0xff]   ;;  %v2074_v12 = vld [vmem:[#allocation2 + $0x64] ss:$16 sps:$4 sm:$0xff]   ;;  %v2076_v13 = vld [vmem:[#allocation2 + $0x6c] ss:$16 sps:$4 sm:$0xff]  }
  0x17   :  { %v2078_v14 = vld [vmem:[#allocation2 + $0x60] ss:$16 sps:$4 sm:$0xff]   ;;  %v2079_v15 = vld [vmem:[#allocation2 + $0x68] ss:$16 sps:$4 sm:$0xff]   ;;  %v2080_v16 = vld [vmem:[#allocation2 + $0x84] ss:$16 sps:$4 sm:$0xff]  }
  0x18   :  { %1256 = vmatpush1.bf16.msra.mxu0 %v2066_v6  ;;  %1468 = vmatpush1.bf16.msra.mxu1 %v2067_v7  ;;  %v2082_v17 = vld [vmem:[#allocation2 + $0x8c] ss:$16 sps:$4 sm:$0xff]   ;;  %v2084_v18 = vld [vmem:[#allocation2 + $0x80] ss:$16 sps:$4 sm:$0xff]   ;;  %v2085_v19 = vld [vmem:[#allocation2 + $0x88] ss:$16 sps:$4 sm:$0xff]  }
  0x19   :  { %1257 = vmatprep.subr.bf16.mxu0 %v2068_v8  ;;  %1469 = vmatprep.subr.bf16.mxu1 %v2070_v9  ;;  %v2086_v20 = vld [vmem:[#allocation2 + $0xa4] ss:$16 sps:$4 sm:$0xff]   ;;  %v2088_v21 = vld [vmem:[#allocation2 + $0xac] ss:$16 sps:$4 sm:$0xff]   ;;  %v2090_v22 = vld [vmem:[#allocation2 + $0xa0] ss:$16 sps:$4 sm:$0xff]  }
  0x1a   :  { %v2091_v23 = vld [vmem:[#allocation2 + $0xa8] ss:$16 sps:$4 sm:$0xff]   ;;  %v2092_v24 = vld [vmem:[#allocation2 + $0xc4] ss:$16 sps:$4 sm:$0xff]   ;;  %v2094_v25 = vld [vmem:[#allocation2 + $0xcc] ss:$16 sps:$4 sm:$0xff]  }
  0x1b   :  { %v2096_v26 = vld [vmem:[#allocation2 + $0xc0] ss:$16 sps:$4 sm:$0xff]   ;;  %v2097_v27 = vld [vmem:[#allocation2 + $0xc8] ss:$16 sps:$4 sm:$0xff]   ;;  %v2098_v28 = vld [vmem:[#allocation2 + $0xe4] ss:$16 sps:$4 sm:$0xff]  }
  0x1c   :  { %1258 = vmatpush1.bf16.msra.mxu0 %v2072_v10  ;;  %1470 = vmatpush1.bf16.msra.mxu1 %v2073_v11  ;;  %v2100_v29 = vld [vmem:[#allocation2 + $0xec] ss:$16 sps:$4 sm:$0xff]   ;;  %v2102_v30 = vld [vmem:[#allocation2 + $0xe0] ss:$16 sps:$4 sm:$0xff]   ;;  %v2103_v31 = vld [vmem:[#allocation2 + $0xe8] ss:$16 sps:$4 sm:$0xff]  }
  0x1d   :  { %1259 = vmatprep.subr.bf16.mxu0 %v2074_v12  ;;  %1471 = vmatprep.subr.bf16.mxu1 %v2076_v13  ;;  %v2104_v32 = vld [vmem:[#allocation2 + $0x104] ss:$16 sps:$4 sm:$0xff]   ;;  %v2106_v33 = vld [vmem:[#allocation2 + $0x10c] ss:$16 sps:$4 sm:$0xff]   ;;  %v2108_v34 = vld [vmem:[#allocation2 + $0x100] ss:$16 sps:$4 sm:$0xff]  }
  0x1e   :  { %v2109_v35 = vld [vmem:[#allocation2 + $0x108] ss:$16 sps:$4 sm:$0xff]   ;;  %v2110_v36 = vld [vmem:[#allocation2 + $0x124] ss:$16 sps:$4 sm:$0xff]   ;;  %v2112_v37 = vld [vmem:[#allocation2 + $0x12c] ss:$16 sps:$4 sm:$0xff]  }
  0x1f   :  { %v2114_v38 = vld [vmem:[#allocation2 + $0x120] ss:$16 sps:$4 sm:$0xff]   ;;  %v2115_v39 = vld [vmem:[#allocation2 + $0x128] ss:$16 sps:$4 sm:$0xff]   ;;  %v2116_v40 = vld [vmem:[#allocation2 + $0x144] ss:$16 sps:$4 sm:$0xff]  }
  0x20   :  { %1260 = vmatpush1.bf16.msra.mxu0 %v2078_v14  ;;  %1472 = vmatpush1.bf16.msra.mxu1 %v2079_v15  ;;  %v2118_v41 = vld [vmem:[#allocation2 + $0x14c] ss:$16 sps:$4 sm:$0xff]   ;;  %v2120_v42 = vld [vmem:[#allocation2 + $0x140] ss:$16 sps:$4 sm:$0xff]   ;;  %v2121_v43 = vld [vmem:[#allocation2 + $0x148] ss:$16 sps:$4 sm:$0xff]  }
  0x21   :  { %1261 = vmatprep.subr.bf16.mxu0 %v2080_v16  ;;  %1473 = vmatprep.subr.bf16.mxu1 %v2082_v17  ;;  %v2122_v44 = vld [vmem:[#allocation2 + $0x164] ss:$16 sps:$4 sm:$0xff]   ;;  %v2124_v45 = vld [vmem:[#allocation2 + $0x16c] ss:$16 sps:$4 sm:$0xff]   ;;  %v2126_v48 = vld [vmem:[#allocation2 + $0x160] ss:$16 sps:$4 sm:$0xff]  }
  0x22   :  { %v29_v46 = vld [vmem:[%s2562_s0 + $0x8] sm:$0xff]  ;;  %v36_v47 = vld [vmem:[%s2562_s0 + $0x40] sm:$0xff]  ;;  %v35_v5 = vld [vmem:[%s2562_s0 + $0x38] sm:$0xff]  ;;  %vm1246_vm0 = vcmask 130048   ;;  %vm1781_vm1 = vcmask 1040384   ;;  %vm1786_vm2 = vcmask 1041408  }
  0x23   :  { %v2127_v49 = vld [vmem:[#allocation2 + $0x168] ss:$16 sps:$4 sm:$0xff]   ;;  %v57_v50 = vpack.c.bf16 %v36_v47, %v29_v46  ;;  %v2128_v51 = vld [vmem:[#allocation2 + $0x184] ss:$16 sps:$4 sm:$0xff]   ;;  %v2130_v52 = vld [vmem:[#allocation2 + $0x18c] ss:$16 sps:$4 sm:$0xff]  }
  0x24   :  { %1262 = vmatpush1.bf16.msra.mxu0 %v2084_v18  ;;  %1474 = vmatpush1.bf16.msra.mxu1 %v2085_v19  ;;  %v2132_v53 = vld [vmem:[#allocation2 + $0x180] ss:$16 sps:$4 sm:$0xff]   ;;  %v2133_v54 = vld [vmem:[#allocation2 + $0x188] ss:$16 sps:$4 sm:$0xff]   ;;  %v2134_v55 = vld [vmem:[#allocation2 + $0x1a4] ss:$16 sps:$4 sm:$0xff]  }
  0x25   :  { %1263 = vmatprep.subr.bf16.mxu0 %v2086_v20  ;;  %1475 = vmatprep.subr.bf16.mxu1 %v2088_v21  ;;  %v2136_v56 = vld [vmem:[#allocation2 + $0x1ac] ss:$16 sps:$4 sm:$0xff]   ;;  %v2138_v57 = vld [vmem:[#allocation2 + $0x1a0] ss:$16 sps:$4 sm:$0xff]   ;;  %v2139_v58 = vld [vmem:[#allocation2 + $0x1a8] ss:$16 sps:$4 sm:$0xff]  }
  0x26   :  { %1285 = vmatprep.mubr.bf16.mxu0 %v57_v50  ;;  %1497 = vmatprep.mubr.bf16.mxu1 %v57_v50  ;;  %v2140_v59 = vld [vmem:[#allocation2 + $0x1c4] ss:$16 sps:$4 sm:$0xff]   ;;  %v2142_v60 = vld [vmem:[#allocation2 + $0x1cc] ss:$16 sps:$4 sm:$0xff]   ;;  %v2144_v61 = vld [vmem:[#allocation2 + $0x1c0] ss:$16 sps:$4 sm:$0xff]  }
  0x27   :  { %v2145_v62 = vld [vmem:[#allocation2 + $0x1c8] ss:$16 sps:$4 sm:$0xff]   ;;  %v2146_v63 = vld [vmem:[#allocation2 + $0x1e4] ss:$16 sps:$4 sm:$0xff]   ;;  %v2148_v0 = vld [vmem:[#allocation2 + $0x1ec] ss:$16 sps:$4 sm:$0xff]  }
  0x28   :  { %1264 = vmatpush1.bf16.msra.mxu0 %v2090_v22  ;;  %1476 = vmatpush1.bf16.msra.mxu1 %v2091_v23  ;;  %v2150_v1 = vld [vmem:[#allocation2 + $0x1e0] ss:$16 sps:$4 sm:$0xff]   ;;  %v2151_v2 = vld [vmem:[#allocation2 + $0x1e8] ss:$16 sps:$4 sm:$0xff]   ;;  %v2154_v3 = vld [vmem:[#allocation2 + $0x204] ss:$16 sps:$4 sm:$0xff]  }
  0x29   :  { %1265 = vmatprep.subr.bf16.mxu0 %v2092_v24  ;;  %1477 = vmatprep.subr.bf16.mxu1 %v2094_v25  ;;  %v28_v4 = vld [vmem:[%s2562_s0] sm:$0xff]  ;;  %v2157_v6 = vld [vmem:[#allocation2 + $0x20c] ss:$16 sps:$4 sm:$0xff]   ;;  %v2155_v8 = vld [vmem:[#allocation2 + $0x208] ss:$16 sps:$4 sm:$0xff]  }
  0x2a   :  { %v2152_v7 = vld [vmem:[#allocation2 + $0x200] ss:$16 sps:$4 sm:$0xff]   ;;  %v56_v9 = vpack.c.bf16 %v35_v5, %v28_v4  ;;  %v2160_v10 = vld [vmem:[#allocation2 + $0x224] ss:$16 sps:$4 sm:$0xff]   ;;  %v2163_v11 = vld [vmem:[#allocation2 + $0x22c] ss:$16 sps:$4 sm:$0xff]  }
  0x2b   :  { %v2158_v12 = vld [vmem:[#allocation2 + $0x220] ss:$16 sps:$4 sm:$0xff]   ;;  %v2161_v13 = vld [vmem:[#allocation2 + $0x228] ss:$16 sps:$4 sm:$0xff]   ;;  %v2166_v14 = vld [vmem:[#allocation2 + $0x244] ss:$16 sps:$4 sm:$0xff]  }
  0x2c   :  { %1266 = vmatpush1.bf16.msra.mxu0 %v2096_v26  ;;  %1478 = vmatpush1.bf16.msra.mxu1 %v2097_v27  ;;  %v2169_v15 = vld [vmem:[#allocation2 + $0x24c] ss:$16 sps:$4 sm:$0xff]   ;;  %v2164_v16 = vld [vmem:[#allocation2 + $0x240] ss:$16 sps:$4 sm:$0xff]   ;;  %v2167_v17 = vld [vmem:[#allocation2 + $0x248] ss:$16 sps:$4 sm:$0xff]  }
  0x2d   :  { %1267 = vmatprep.subr.bf16.mxu0 %v2098_v28  ;;  %1479 = vmatprep.subr.bf16.mxu1 %v2100_v29  ;;  %v2172_v18 = vld [vmem:[#allocation2 + $0x264] ss:$16 sps:$4 sm:$0xff]   ;;  %v2175_v19 = vld [vmem:[#allocation2 + $0x26c] ss:$16 sps:$4 sm:$0xff]   ;;  %v2170_v20 = vld [vmem:[#allocation2 + $0x260] ss:$16 sps:$4 sm:$0xff]  }
  0x2e   :  { %v2173_v21 = vld [vmem:[#allocation2 + $0x268] ss:$16 sps:$4 sm:$0xff]   ;;  %v2178_v22 = vld [vmem:[#allocation2 + $0x284] ss:$16 sps:$4 sm:$0xff]   ;;  %v2181_v23 = vld [vmem:[#allocation2 + $0x28c] ss:$16 sps:$4 sm:$0xff]  }
  0x2f   :  { %v2176_v24 = vld [vmem:[#allocation2 + $0x280] ss:$16 sps:$4 sm:$0xff]   ;;  %v2179_v25 = vld [vmem:[#allocation2 + $0x288] ss:$16 sps:$4 sm:$0xff]   ;;  %v2184_v26 = vld [vmem:[#allocation2 + $0x2a4] ss:$16 sps:$4 sm:$0xff]  }
  0x30   :  { %1268 = vmatpush1.bf16.msra.mxu0 %v2102_v30  ;;  %1480 = vmatpush1.bf16.msra.mxu1 %v2103_v31  ;;  %v2187_v27 = vld [vmem:[#allocation2 + $0x2ac] ss:$16 sps:$4 sm:$0xff]   ;;  %v50_v29 = vld [vmem:[%s2562_s0 + $0xb0] sm:$0xff]  ;;  %v2197_v46 = vld [vmem:[#allocation2 + $0x2e8] ss:$16 sps:$4 sm:$0xff]  }
  0x31   :  { %1269 = vmatprep.subr.bf16.mxu0 %v2104_v32  ;;  %1481 = vmatprep.subr.bf16.mxu1 %v2106_v33  ;;  %v43_v28 = vld [vmem:[%s2562_s0 + $0x78] sm:$0xff]  ;;  %v2182_v30 = vld [vmem:[#allocation2 + $0x2a0] ss:$16 sps:$4 sm:$0xff]   ;;  %v2190_v33 = vld [vmem:[#allocation2 + $0x2c4] ss:$16 sps:$4 sm:$0xff]  }
  0x32   :  { %v64_v31 = vpack.c.bf16 %v50_v29, %v43_v28  ;;  %v2185_v32 = vld [vmem:[#allocation2 + $0x2a8] ss:$16 sps:$4 sm:$0xff]   ;;  %v2202_v47 = vld [vmem:[#allocation2 + $0x304] ss:$16 sps:$4 sm:$0xff]   ;;  %v2235_v4 = vld [vmem:[#allocation2 + $0x3ac] ss:$16 sps:$4 sm:$0xff]  }
  0x33   :  { %v2203_v50 = vld [vmem:[#allocation2 + $0x308] ss:$16 sps:$4 sm:$0xff]   ;;  %v2230_v5 = vld [vmem:[#allocation2 + $0x3a0] ss:$16 sps:$4 sm:$0xff]  }
  0x34   :  { %1270 = vmatpush1.bf16.msra.mxu0 %v2108_v34  ;;  %1482 = vmatpush1.bf16.msra.mxu1 %v2109_v35  ;;  %v2193_v34 = vld [vmem:[#allocation2 + $0x2cc] ss:$16 sps:$4 sm:$0xff]   ;;  %v42_v35 = vld [vmem:[%s2562_s0 + $0x70] sm:$0xff]  ;;  %v2257_v28 = vld [vmem:[#allocation2 + $0x428] ss:$16 sps:$4 sm:$0xff]  }
  0x35   :  { %1271 = vmatprep.subr.bf16.mxu0 %v2110_v36  ;;  %1483 = vmatprep.subr.bf16.mxu1 %v2112_v37  ;;  %v49_v36 = vld [vmem:[%s2562_s0 + $0xa8] sm:$0xff]  ;;  %v44_v29 = vld [vmem:[%s2562_s0 + $0x80] sm:$0xff] }
  0x36   :  { %v63_v37 = vpack.c.bf16 %v49_v36, %v42_v35  ;;  %v33_v35 = vld [vmem:[%s2562_s0 + $0x28] sm:$0xff]  ;;  %v40_v36 = vld [vmem:[%s2562_s0 + $0x60] sm:$0xff] }
  0x38   :  { %1272 = vmatpush1.bf16.msra.mxu0 %v2114_v38  ;;  %1484 = vmatpush1.bf16.msra.mxu1 %v2115_v39  ;;  %v2188_v38 = vld [vmem:[#allocation2 + $0x2c0] ss:$16 sps:$4 sm:$0xff]   ;;  %v2191_v39 = vld [vmem:[#allocation2 + $0x2c8] ss:$16 sps:$4 sm:$0xff]  }
  0x39   :  { %1273 = vmatprep.subr.bf16.mxu0 %v2116_v40  ;;  %1485 = vmatprep.subr.bf16.mxu1 %v2118_v41  ;;  %v31_v40 = vld [vmem:[%s2562_s0 + $0x18] sm:$0xff]  ;;  %v38_v41 = vld [vmem:[%s2562_s0 + $0x50] sm:$0xff] }
  0x3c   :  { %1274 = vmatpush1.bf16.msra.mxu0 %v2120_v42  ;;  %1486 = vmatpush1.bf16.msra.mxu1 %v2121_v43  ;;  %v2196_v42 = vld [vmem:[#allocation2 + $0x2e4] ss:$16 sps:$4 sm:$0xff]   ;;  %v2199_v43 = vld [vmem:[#allocation2 + $0x2ec] ss:$16 sps:$4 sm:$0xff]  }
  0x3d   :  { %1275 = vmatprep.subr.bf16.mxu0 %v2122_v44  ;;  %1487 = vmatprep.subr.bf16.mxu1 %v2124_v45  ;;  %v59_v44 = vpack.c.bf16 %v38_v41, %v31_v40  ;;  %v2194_v45 = vld [vmem:[#allocation2 + $0x2e0] ss:$16 sps:$4 sm:$0xff]   ;;  %v61_v40 = vpack.c.bf16 %v40_v36, %v33_v35  ;;  %v2347_v35 = vld [vmem:[#allocation2 + $0x608] ss:$16 sps:$4 sm:$0xff]  }
  0x3e   :  { %v2266_v41 = vld [vmem:[#allocation2 + $0x460] ss:$16 sps:$4 sm:$0xff]  }
  0x40   :  { %1276 = vmatpush1.bf16.msra.mxu0 %v2126_v48  ;;  %1488 = vmatpush1.bf16.msra.mxu1 %v2127_v49  ;;  %v2205_v48 = vld [vmem:[#allocation2 + $0x30c] ss:$16 sps:$4 sm:$0xff]   ;;  %v2200_v49 = vld [vmem:[#allocation2 + $0x300] ss:$16 sps:$4 sm:$0xff]  }
  0x41   :  { %1277 = vmatprep.subr.bf16.mxu0 %v2128_v51  ;;  %1489 = vmatprep.subr.bf16.mxu1 %v2130_v52  ;;  %v2208_v51 = vld [vmem:[#allocation2 + $0x324] ss:$16 sps:$4 sm:$0xff]   ;;  %v2211_v52 = vld [vmem:[#allocation2 + $0x32c] ss:$16 sps:$4 sm:$0xff]  }
  0x44   :  { %1278 = vmatpush1.bf16.msra.mxu0 %v2132_v53  ;;  %1490 = vmatpush1.bf16.msra.mxu1 %v2133_v54  ;;  %v2206_v53 = vld [vmem:[#allocation2 + $0x320] ss:$16 sps:$4 sm:$0xff]   ;;  %v2209_v54 = vld [vmem:[#allocation2 + $0x328] ss:$16 sps:$4 sm:$0xff]  }
  0x45   :  { %1279 = vmatprep.subr.bf16.mxu0 %v2134_v55  ;;  %1491 = vmatprep.subr.bf16.mxu1 %v2136_v56  ;;  %v2214_v55 = vld [vmem:[#allocation2 + $0x344] ss:$16 sps:$4 sm:$0xff]   ;;  %v2217_v56 = vld [vmem:[#allocation2 + $0x34c] ss:$16 sps:$4 sm:$0xff]  }
  0x48   :  { %1280 = vmatpush1.bf16.msra.mxu0 %v2138_v57  ;;  %1492 = vmatpush1.bf16.msra.mxu1 %v2139_v58  ;;  %v2212_v57 = vld [vmem:[#allocation2 + $0x340] ss:$16 sps:$4 sm:$0xff]   ;;  %v2215_v58 = vld [vmem:[#allocation2 + $0x348] ss:$16 sps:$4 sm:$0xff]  }
  0x49   :  { %1281 = vmatprep.subr.bf16.mxu0 %v2140_v59  ;;  %1493 = vmatprep.subr.bf16.mxu1 %v2142_v60  ;;  %v2220_v59 = vld [vmem:[#allocation2 + $0x364] ss:$16 sps:$4 sm:$0xff]   ;;  %v2223_v60 = vld [vmem:[#allocation2 + $0x36c] ss:$16 sps:$4 sm:$0xff]  }
  0x4c   :  { %1282 = vmatpush1.bf16.msra.mxu0 %v2144_v61  ;;  %1494 = vmatpush1.bf16.msra.mxu1 %v2145_v62  ;;  %v2218_v61 = vld [vmem:[#allocation2 + $0x360] ss:$16 sps:$4 sm:$0xff]   ;;  %v2221_v62 = vld [vmem:[#allocation2 + $0x368] ss:$16 sps:$4 sm:$0xff]  }
  0x4d   :  { %1283 = vmatprep.subr.bf16.mxu0 %v2146_v63  ;;  %1495 = vmatprep.subr.bf16.mxu1 %v2148_v0  ;;  %v2226_v63 = vld [vmem:[#allocation2 + $0x384] ss:$16 sps:$4 sm:$0xff]   ;;  %v2229_v0 = vld [vmem:[#allocation2 + $0x38c] ss:$16 sps:$4 sm:$0xff]  }
  0x50   :  { %1284 = vmatpush1.bf16.msra.mxu0 %v2150_v1  ;;  %1496 = vmatpush1.bf16.msra.mxu1 %v2151_v2  ;;  %v2224_v1 = vld [vmem:[#allocation2 + $0x380] ss:$16 sps:$4 sm:$0xff]   ;;  %v2227_v2 = vld [vmem:[#allocation2 + $0x388] ss:$16 sps:$4 sm:$0xff]  }
  0x51   :  { %1306 = vmatprep.subr.bf16.mxu0 %v2154_v3  ;;  %1518 = vmatprep.subr.bf16.mxu1 %v2157_v6  ;;  %v2232_v3 = vld [vmem:[#allocation2 + $0x3a4] ss:$16 sps:$4 sm:$0xff]   ;;  %v2233_v6 = vld [vmem:[#allocation2 + $0x3a8] ss:$16 sps:$4 sm:$0xff]  }
  0x53   :  { %1286 = vmatmul.mubr.bf16.vlgmr.msra.gmra.mrb[0].mxu0 %v56_v9  ;;  %1498 = vmatmul.mubr.bf16.vlgmr.msra.gmra.mrb[0].mxu1 %v56_v9  ;;  %v2236_v9 = vld [vmem:[#allocation2 + $0x3c0] ss:$16 sps:$4 sm:$0xff]  }
  0x54   :  { %1307 = vmatpush1.bf16.msra.mxu0 %v2152_v7  ;;  %1519 = vmatpush1.bf16.msra.mxu1 %v2155_v8  ;;  %v2238_v7 = vld [vmem:[#allocation2 + $0x3c4] ss:$16 sps:$4 sm:$0xff]   ;;  %v2241_v8 = vld [vmem:[#allocation2 + $0x3cc] ss:$16 sps:$4 sm:$0xff]  }
  0x55   :  { %1308 = vmatprep.subr.bf16.mxu0 %v2160_v10  ;;  %1520 = vmatprep.subr.bf16.mxu1 %v2163_v11  ;;  %v2239_v10 = vld [vmem:[#allocation2 + $0x3c8] ss:$16 sps:$4 sm:$0xff]   ;;  %v2244_v11 = vld [vmem:[#allocation2 + $0x3e4] ss:$16 sps:$4 sm:$0xff]  }
  0x56   :  { %1295 = vmatprep.mubr.bf16.mxu0 %v64_v31  ;;  %1507 = vmatprep.mubr.bf16.mxu1 %v64_v31  ;;  %v2262_v31 = vld [vmem:[#allocation2 + $0x444] ss:$16 sps:$4 sm:$0xff]  }
  0x58   :  { %1309 = vmatpush1.bf16.msra.mxu0 %v2158_v12  ;;  %1521 = vmatpush1.bf16.msra.mxu1 %v2161_v13  ;;  %v2247_v12 = vld [vmem:[#allocation2 + $0x3ec] ss:$16 sps:$4 sm:$0xff]   ;;  %v2242_v13 = vld [vmem:[#allocation2 + $0x3e0] ss:$16 sps:$4 sm:$0xff]  }
  0x59   :  { %1310 = vmatprep.subr.bf16.mxu0 %v2166_v14  ;;  %1522 = vmatprep.subr.bf16.mxu1 %v2169_v15  ;;  %v2245_v14 = vld [vmem:[#allocation2 + $0x3e8] ss:$16 sps:$4 sm:$0xff]   ;;  %v2250_v15 = vld [vmem:[#allocation2 + $0x404] ss:$16 sps:$4 sm:$0xff]  }
  0x5b   :  { %1296 = vmatmul.mubr.bf16.gmra.mrb[4].mxu0 %v63_v37  ;;  %1508 = vmatmul.mubr.bf16.gmra.mrb[4].mxu1 %v63_v37  ;;  %v2263_v37 = vld [vmem:[#allocation2 + $0x448] ss:$16 sps:$4 sm:$0xff]  }
  0x5c   :  { %1311 = vmatpush1.bf16.msra.mxu0 %v2164_v16  ;;  %1523 = vmatpush1.bf16.msra.mxu1 %v2167_v17  ;;  %v30_v16 = vld [vmem:[%s2562_s0 + $0x10] sm:$0xff]  ;;  %v37_v17 = vld [vmem:[%s2562_s0 + $0x48] sm:$0xff] }
  0x5d   :  { %1312 = vmatprep.subr.bf16.mxu0 %v2172_v18  ;;  %1524 = vmatprep.subr.bf16.mxu1 %v2175_v19  ;;  %v2253_v18 = vld [vmem:[#allocation2 + $0x40c] ss:$16 sps:$4 sm:$0xff]   ;;  %v2248_v19 = vld [vmem:[#allocation2 + $0x400] ss:$16 sps:$4 sm:$0xff]  }
  0x5e   :  { %1338 = vmatprep.mubr.bf16.mxu0 %v59_v44  ;;  %1550 = vmatprep.mubr.bf16.mxu1 %v59_v44  ;;  %v2277_v44 = vld [vmem:[#allocation2 + $0x48c] ss:$16 sps:$4 sm:$0xff]  }
  0x60   :  { %1313 = vmatpush1.bf16.msra.mxu0 %v2170_v20  ;;  %1525 = vmatpush1.bf16.msra.mxu1 %v2173_v21  ;;  %v2251_v20 = vld [vmem:[#allocation2 + $0x408] ss:$16 sps:$4 sm:$0xff]   ;;  %v58_v21 = vpack.c.bf16 %v37_v17, %v30_v16  ;;  %v2331_v16 = vld [vmem:[#allocation2 + $0x5ac] ss:$16 sps:$4 sm:$0xff]   ;;  %v2326_v17 = vld [vmem:[#allocation2 + $0x5a0] ss:$16 sps:$4 sm:$0xff]  }
  0x61   :  { %1314 = vmatprep.subr.bf16.mxu0 %v2178_v22  ;;  %1526 = vmatprep.subr.bf16.mxu1 %v2181_v23  ;;  %v45_v22 = vld [vmem:[%s2562_s0 + $0x88] sm:$0xff]  ;;  %v52_v23 = vld [vmem:[%s2562_s0 + $0xc0] sm:$0xff] }
  0x64   :  { %1315 = vmatpush1.bf16.msra.mxu0 %v2176_v24  ;;  %1527 = vmatpush1.bf16.msra.mxu1 %v2179_v25  ;;  %v2256_v24 = vld [vmem:[#allocation2 + $0x424] ss:$16 sps:$4 sm:$0xff]   ;;  %v2259_v25 = vld [vmem:[#allocation2 + $0x42c] ss:$16 sps:$4 sm:$0xff]  }
  0x65   :  { %1316 = vmatprep.subr.bf16.mxu0 %v2184_v26  ;;  %1528 = vmatprep.subr.bf16.mxu1 %v2187_v27  ;;  %v2254_v26 = vld [vmem:[#allocation2 + $0x420] ss:$16 sps:$4 sm:$0xff]   ;;  %v66_v27 = vpack.c.bf16 %v52_v23, %v45_v22  ;;  %v2335_v22 = vld [vmem:[#allocation2 + $0x5c8] ss:$16 sps:$4 sm:$0xff]   ;;  %v2340_v23 = vld [vmem:[#allocation2 + $0x5e4] ss:$16 sps:$4 sm:$0xff]  }
  0x68   :  { %1317 = vmatpush1.bf16.msra.mxu0 %v2182_v30  ;;  %1529 = vmatpush1.bf16.msra.mxu1 %v2185_v32  ;;  %v51_v30 = vld [vmem:[%s2562_s0 + $0xb8] sm:$0xff] }
  0x69   :  { %1318 = vmatprep.subr.bf16.mxu0 %v2190_v33  ;;  %1530 = vmatprep.subr.bf16.mxu1 %v2193_v34  ;;  %v2265_v32 = vld [vmem:[#allocation2 + $0x44c] ss:$16 sps:$4 sm:$0xff]   ;;  %v2260_v33 = vld [vmem:[#allocation2 + $0x440] ss:$16 sps:$4 sm:$0xff]   ;;  %v65_v34 = vpack.c.bf16 %v51_v30, %v44_v29  ;;  %v2346_v29 = vld [vmem:[#allocation2 + $0x604] ss:$16 sps:$4 sm:$0xff]  }
  0x6a   :  { %v2349_v30 = vld [vmem:[#allocation2 + $0x60c] ss:$16 sps:$4 sm:$0xff]  }
  0x6c   :  { %1319 = vmatpush1.bf16.msra.mxu0 %v2188_v38  ;;  %1531 = vmatpush1.bf16.msra.mxu1 %v2191_v39  ;;  %v2268_v38 = vld [vmem:[#allocation2 + $0x464] ss:$16 sps:$4 sm:$0xff]   ;;  %v2271_v39 = vld [vmem:[#allocation2 + $0x46c] ss:$16 sps:$4 sm:$0xff]  }
  0x6d   :  { %1320 = vmatprep.subr.bf16.mxu0 %v2196_v42  ;;  %1532 = vmatprep.subr.bf16.mxu1 %v2199_v43  ;;  %v2269_v42 = vld [vmem:[#allocation2 + $0x468] ss:$16 sps:$4 sm:$0xff]   ;;  %v2274_v43 = vld [vmem:[#allocation2 + $0x484] ss:$16 sps:$4 sm:$0xff]  }
  0x70   :  { %1321 = vmatpush1.bf16.msra.mxu0 %v2194_v45  ;;  %1533 = vmatpush1.bf16.msra.mxu1 %v2197_v46  ;;  %v2272_v45 = vld [vmem:[#allocation2 + $0x480] ss:$16 sps:$4 sm:$0xff]   ;;  %v2275_v46 = vld [vmem:[#allocation2 + $0x488] ss:$16 sps:$4 sm:$0xff]  }
  0x71   :  { %1322 = vmatprep.subr.bf16.mxu0 %v2202_v47  ;;  %1534 = vmatprep.subr.bf16.mxu1 %v2205_v48  ;;  %v2280_v47 = vld [vmem:[#allocation2 + $0x4a4] ss:$16 sps:$4 sm:$0xff]   ;;  %v2283_v48 = vld [vmem:[#allocation2 + $0x4ac] ss:$16 sps:$4 sm:$0xff]  }
  0x74   :  { %1323 = vmatpush1.bf16.msra.mxu0 %v2200_v49  ;;  %1535 = vmatpush1.bf16.msra.mxu1 %v2203_v50  ;;  %v2278_v49 = vld [vmem:[#allocation2 + $0x4a0] ss:$16 sps:$4 sm:$0xff]   ;;  %v2281_v50 = vld [vmem:[#allocation2 + $0x4a8] ss:$16 sps:$4 sm:$0xff]  }
  0x75   :  { %1324 = vmatprep.subr.bf16.mxu0 %v2208_v51  ;;  %1536 = vmatprep.subr.bf16.mxu1 %v2211_v52  ;;  %v2286_v51 = vld [vmem:[#allocation2 + $0x4c4] ss:$16 sps:$4 sm:$0xff]   ;;  %v2289_v52 = vld [vmem:[#allocation2 + $0x4cc] ss:$16 sps:$4 sm:$0xff]  }
  0x78   :  { %1325 = vmatpush1.bf16.msra.mxu0 %v2206_v53  ;;  %1537 = vmatpush1.bf16.msra.mxu1 %v2209_v54  ;;  %v2284_v53 = vld [vmem:[#allocation2 + $0x4c0] ss:$16 sps:$4 sm:$0xff]   ;;  %v2287_v54 = vld [vmem:[#allocation2 + $0x4c8] ss:$16 sps:$4 sm:$0xff]  }
  0x79   :  { %1326 = vmatprep.subr.bf16.mxu0 %v2214_v55  ;;  %1538 = vmatprep.subr.bf16.mxu1 %v2217_v56  ;;  %v2292_v55 = vld [vmem:[#allocation2 + $0x4e4] ss:$16 sps:$4 sm:$0xff]   ;;  %v2295_v56 = vld [vmem:[#allocation2 + $0x4ec] ss:$16 sps:$4 sm:$0xff]  }
  0x7c   :  { %1327 = vmatpush1.bf16.msra.mxu0 %v2212_v57  ;;  %1539 = vmatpush1.bf16.msra.mxu1 %v2215_v58  ;;  %v2290_v57 = vld [vmem:[#allocation2 + $0x4e0] ss:$16 sps:$4 sm:$0xff]   ;;  %v2293_v58 = vld [vmem:[#allocation2 + $0x4e8] ss:$16 sps:$4 sm:$0xff]  }
  0x7d   :  { %1328 = vmatprep.subr.bf16.mxu0 %v2220_v59  ;;  %1540 = vmatprep.subr.bf16.mxu1 %v2223_v60  ;;  %v2298_v59 = vld [vmem:[#allocation2 + $0x504] ss:$16 sps:$4 sm:$0xff]   ;;  %v2301_v60 = vld [vmem:[#allocation2 + $0x50c] ss:$16 sps:$4 sm:$0xff]  }
  0x80   :  { %1329 = vmatpush1.bf16.msra.mxu0 %v2218_v61  ;;  %1541 = vmatpush1.bf16.msra.mxu1 %v2221_v62  ;;  %v2296_v61 = vld [vmem:[#allocation2 + $0x500] ss:$16 sps:$4 sm:$0xff]   ;;  %v2299_v62 = vld [vmem:[#allocation2 + $0x508] ss:$16 sps:$4 sm:$0xff]  }
  0x81   :  { %1330 = vmatprep.subr.bf16.mxu0 %v2226_v63  ;;  %1542 = vmatprep.subr.bf16.mxu1 %v2229_v0  ;;  %v2304_v63 = vld [vmem:[#allocation2 + $0x524] ss:$16 sps:$4 sm:$0xff]   ;;  %v2307_v0 = vld [vmem:[#allocation2 + $0x52c] ss:$16 sps:$4 sm:$0xff]  }
  0x84   :  { %1331 = vmatpush1.bf16.msra.mxu0 %v2224_v1  ;;  %1543 = vmatpush1.bf16.msra.mxu1 %v2227_v2  ;;  %v2302_v1 = vld [vmem:[#allocation2 + $0x520] ss:$16 sps:$4 sm:$0xff]   ;;  %v2305_v2 = vld [vmem:[#allocation2 + $0x528] ss:$16 sps:$4 sm:$0xff]  }
  0x85   :  { %1332 = vmatprep.subr.bf16.mxu0 %v2232_v3  ;;  %1544 = vmatprep.subr.bf16.mxu1 %v2235_v4  ;;  %v2310_v3 = vld [vmem:[#allocation2 + $0x544] ss:$16 sps:$4 sm:$0xff]   ;;  %v2313_v4 = vld [vmem:[#allocation2 + $0x54c] ss:$16 sps:$4 sm:$0xff]  }
  0x88   :  { %1333 = vmatpush1.bf16.msra.mxu0 %v2230_v5  ;;  %1545 = vmatpush1.bf16.msra.mxu1 %v2233_v6  ;;  %v2308_v5 = vld [vmem:[#allocation2 + $0x540] ss:$16 sps:$4 sm:$0xff]   ;;  %v2311_v6 = vld [vmem:[#allocation2 + $0x548] ss:$16 sps:$4 sm:$0xff]  }
  0x89   :  { %1334 = vmatprep.subr.bf16.mxu0 %v2238_v7  ;;  %1546 = vmatprep.subr.bf16.mxu1 %v2241_v8  ;;  %v2316_v7 = vld [vmem:[#allocation2 + $0x564] ss:$16 sps:$4 sm:$0xff]   ;;  %v2319_v8 = vld [vmem:[#allocation2 + $0x56c] ss:$16 sps:$4 sm:$0xff]  }
  0x8c   :  { %1335 = vmatpush1.bf16.msra.mxu0 %v2236_v9  ;;  %1547 = vmatpush1.bf16.msra.mxu1 %v2239_v10  ;;  %v2314_v9 = vld [vmem:[#allocation2 + $0x560] ss:$16 sps:$4 sm:$0xff]   ;;  %v2317_v10 = vld [vmem:[#allocation2 + $0x568] ss:$16 sps:$4 sm:$0xff]  }
  0x8d   :  { %1336 = vmatprep.subr.bf16.mxu0 %v2244_v11  ;;  %1548 = vmatprep.subr.bf16.mxu1 %v2247_v12  ;;  %v2322_v11 = vld [vmem:[#allocation2 + $0x584] ss:$16 sps:$4 sm:$0xff]   ;;  %v2325_v12 = vld [vmem:[#allocation2 + $0x58c] ss:$16 sps:$4 sm:$0xff]  }
  0x90   :  { %1337 = vmatpush1.bf16.msra.mxu0 %v2242_v13  ;;  %1549 = vmatpush1.bf16.msra.mxu1 %v2245_v14  ;;  %v2320_v13 = vld [vmem:[#allocation2 + $0x580] ss:$16 sps:$4 sm:$0xff]   ;;  %v2323_v14 = vld [vmem:[#allocation2 + $0x588] ss:$16 sps:$4 sm:$0xff]  }
  0x91   :  { %1359 = vmatprep.subr.bf16.mxu0 %v2250_v15  ;;  %1571 = vmatprep.subr.bf16.mxu1 %v2253_v18  ;;  %v2328_v15 = vld [vmem:[#allocation2 + $0x5a4] ss:$16 sps:$4 sm:$0xff]   ;;  %v2329_v18 = vld [vmem:[#allocation2 + $0x5a8] ss:$16 sps:$4 sm:$0xff]  }
  0x93   :  { %1339 = vmatmul.mubr.bf16.vlgmr.msra.gmra.mrb[0].mxu0 %v58_v21  ;;  %1551 = vmatmul.mubr.bf16.vlgmr.msra.gmra.mrb[0].mxu1 %v58_v21  ;;  %v2332_v21 = vld [vmem:[#allocation2 + $0x5c0] ss:$16 sps:$4 sm:$0xff]  }
  0x94   :  { %1360 = vmatpush1.bf16.msra.mxu0 %v2248_v19  ;;  %1572 = vmatpush1.bf16.msra.mxu1 %v2251_v20  ;;  %v2334_v19 = vld [vmem:[#allocation2 + $0x5c4] ss:$16 sps:$4 sm:$0xff]   ;;  %v2337_v20 = vld [vmem:[#allocation2 + $0x5cc] ss:$16 sps:$4 sm:$0xff]  }
  0x95   :  { %1361 = vmatprep.subr.bf16.mxu0 %v2256_v24  ;;  %1573 = vmatprep.subr.bf16.mxu1 %v2259_v25  ;;  %v2343_v24 = vld [vmem:[#allocation2 + $0x5ec] ss:$16 sps:$4 sm:$0xff]   ;;  %v2338_v25 = vld [vmem:[#allocation2 + $0x5e0] ss:$16 sps:$4 sm:$0xff]  }
  0x96   :  { %1348 = vmatprep.mubr.bf16.mxu0 %v66_v27  ;;  %1560 = vmatprep.mubr.bf16.mxu1 %v66_v27  ;;  %v32_v27 = vld [vmem:[%s2562_s0 + $0x20] sm:$0xff] }
  0x98   :  { %1362 = vmatpush1.bf16.msra.mxu0 %v2254_v26  ;;  %1574 = vmatpush1.bf16.msra.mxu1 %v2257_v28  ;;  %v2341_v26 = vld [vmem:[#allocation2 + $0x5e8] ss:$16 sps:$4 sm:$0xff]  }
  0x99   :  { %1363 = vmatprep.subr.bf16.mxu0 %v2262_v31  ;;  %1575 = vmatprep.subr.bf16.mxu1 %v2265_v32  ;;  %v39_v28 = vld [vmem:[%s2562_s0 + $0x58] sm:$0xff]  ;;  %v54_v32 = vld [vmem:[%s2562_s0 + $0xd0] sm:$0xff] }
  0x9a   :  { %v47_v31 = vld [vmem:[%s2562_s0 + $0x98] sm:$0xff] }
  0x9b   :  { %1349 = vmatmul.mubr.bf16.gmra.mrb[4].mxu0 %v65_v34  ;;  %1561 = vmatmul.mubr.bf16.gmra.mrb[4].mxu1 %v65_v34  ;;  %v2344_v34 = vld [vmem:[#allocation2 + $0x600] ss:$16 sps:$4 sm:$0xff]   ;;  %v68_v36 = vpack.c.bf16 %v54_v32, %v47_v31 }
  0x9c   :  { %1364 = vmatpush1.bf16.msra.mxu0 %v2260_v33  ;;  %1576 = vmatpush1.bf16.msra.mxu1 %v2263_v37  ;;  %v60_v33 = vpack.c.bf16 %v39_v28, %v32_v27  ;;  %v46_v37 = vld [vmem:[%s2562_s0 + $0x90] sm:$0xff] }
  0x9d   :  { %1365 = vmatprep.subr.bf16.mxu0 %v2268_v38  ;;  %1577 = vmatprep.subr.bf16.mxu1 %v2271_v39  ;;  %v53_v38 = vld [vmem:[%s2562_s0 + $0xc8] sm:$0xff] }
  0x9e   :  { %1391 = vmatprep.mubr.bf16.mxu0 %v61_v40  ;;  %1603 = vmatprep.mubr.bf16.mxu1 %v61_v40  ;;  %v67_v39 = vpack.c.bf16 %v53_v38, %v46_v37  ;;  %v2377_v40 = vmov 0  }
  0xa0   :  { %1366 = vmatpush1.bf16.msra.mxu0 %v2266_v41  ;;  %1578 = vmatpush1.bf16.msra.mxu1 %v2269_v42  ;;  %v34_v41 = vld [vmem:[%s2562_s0 + $0x30] sm:$0xff]  ;;  %v41_v42 = vld [vmem:[%s2562_s0 + $0x68] sm:$0xff] }
  0xa1   :  { %1367 = vmatprep.subr.bf16.mxu0 %v2274_v43  ;;  %1579 = vmatprep.subr.bf16.mxu1 %v2277_v44  ;;  %v62_v43 = vpack.c.bf16 %v41_v42, %v34_v41  ;;  %v48_v44 = vld [vmem:[%s2562_s0 + $0xa0] sm:$0xff] }
  0xa4   :  { %1368 = vmatpush1.bf16.msra.mxu0 %v2272_v45  ;;  %1580 = vmatpush1.bf16.msra.mxu1 %v2275_v46  ;;  %v55_v45 = vld [vmem:[%s2562_s0 + $0xd8] sm:$0xff] }
  0xa5   :  { %1369 = vmatprep.subr.bf16.mxu0 %v2280_v47  ;;  %1581 = vmatprep.subr.bf16.mxu1 %v2283_v48  ;;  %v69_v46 = vpack.c.bf16 %v55_v45, %v48_v44 }
  0xa8   :  { %1370 = vmatpush1.bf16.msra.mxu0 %v2278_v49  ;;  %1582 = vmatpush1.bf16.msra.mxu1 %v2281_v50 }
  0xa9   :  { %1371 = vmatprep.subr.bf16.mxu0 %v2286_v51  ;;  %1583 = vmatprep.subr.bf16.mxu1 %v2289_v52 }
  0xac   :  { %1372 = vmatpush1.bf16.msra.mxu0 %v2284_v53  ;;  %1584 = vmatpush1.bf16.msra.mxu1 %v2287_v54 }
  0xad   :  { %1373 = vmatprep.subr.bf16.mxu0 %v2292_v55  ;;  %1585 = vmatprep.subr.bf16.mxu1 %v2295_v56 }
  0xb0   :  { %1374 = vmatpush1.bf16.msra.mxu0 %v2290_v57  ;;  %1586 = vmatpush1.bf16.msra.mxu1 %v2293_v58 }
  0xb1   :  { %1375 = vmatprep.subr.bf16.mxu0 %v2298_v59  ;;  %1587 = vmatprep.subr.bf16.mxu1 %v2301_v60 }
  0xb4   :  { %1376 = vmatpush1.bf16.msra.mxu0 %v2296_v61  ;;  %1588 = vmatpush1.bf16.msra.mxu1 %v2299_v62 }
  0xb5   :  { %1377 = vmatprep.subr.bf16.mxu0 %v2304_v63  ;;  %1589 = vmatprep.subr.bf16.mxu1 %v2307_v0 }
  0xb8   :  { %1378 = vmatpush1.bf16.msra.mxu0 %v2302_v1  ;;  %1590 = vmatpush1.bf16.msra.mxu1 %v2305_v2 }
  0xb9   :  { %1379 = vmatprep.subr.bf16.mxu0 %v2310_v3  ;;  %1591 = vmatprep.subr.bf16.mxu1 %v2313_v4 }
  0xbc   :  { %1380 = vmatpush1.bf16.msra.mxu0 %v2308_v5  ;;  %1592 = vmatpush1.bf16.msra.mxu1 %v2311_v6 }
  0xbd   :  { %1381 = vmatprep.subr.bf16.mxu0 %v2316_v7  ;;  %1593 = vmatprep.subr.bf16.mxu1 %v2319_v8 }
  0xc0   :  { %1382 = vmatpush1.bf16.msra.mxu0 %v2314_v9  ;;  %1594 = vmatpush1.bf16.msra.mxu1 %v2317_v10 }
  0xc1   :  { %1383 = vmatprep.subr.bf16.mxu0 %v2322_v11  ;;  %1595 = vmatprep.subr.bf16.mxu1 %v2325_v12 }
  0xc4   :  { %1384 = vmatpush1.bf16.msra.mxu0 %v2320_v13  ;;  %1596 = vmatpush1.bf16.msra.mxu1 %v2323_v14 }
  0xc5   :  { %1385 = vmatprep.subr.bf16.mxu0 %v2328_v15  ;;  %1597 = vmatprep.subr.bf16.mxu1 %v2331_v16 }
  0xc8   :  { %1386 = vmatpush1.bf16.msra.mxu0 %v2326_v17  ;;  %1598 = vmatpush1.bf16.msra.mxu1 %v2329_v18 }
  0xc9   :  { %1387 = vmatprep.subr.bf16.mxu0 %v2334_v19  ;;  %1599 = vmatprep.subr.bf16.mxu1 %v2337_v20 }
  0xcc   :  { %1388 = vmatpush1.bf16.msra.mxu0 %v2332_v21  ;;  %1600 = vmatpush1.bf16.msra.mxu1 %v2335_v22 }
  0xcd   :  { %1389 = vmatprep.subr.bf16.mxu0 %v2340_v23  ;;  %1601 = vmatprep.subr.bf16.mxu1 %v2343_v24 }
  0xd0   :  { %1390 = vmatpush1.bf16.msra.mxu0 %v2338_v25  ;;  %1602 = vmatpush1.bf16.msra.mxu1 %v2341_v26 }
  0xd1   :  { %1412 = vmatprep.subr.bf16.mxu0 %v2346_v29  ;;  %1624 = vmatprep.subr.bf16.mxu1 %v2349_v30 }
  0xd3   :  { %1392 = vmatmul.mubr.bf16.vlgmr.msra.gmra.mrb[0].mxu0 %v60_v33  ;;  %1604 = vmatmul.mubr.bf16.vlgmr.msra.gmra.mrb[0].mxu1 %v60_v33 }
  0xd4   :  { %1413 = vmatpush1.bf16.msra.mxu0 %v2344_v34  ;;  %1625 = vmatpush1.bf16.msra.mxu1 %v2347_v35 }
  0xd5   :  { %1401 = vmatprep.mubr.bf16.mxu0 %v68_v36  ;;  %1613 = vmatprep.mubr.bf16.mxu1 %v68_v36 }
  0xdb   :  { %1402 = vmatmul.mubr.bf16.gmra.mrb[4].mxu0 %v67_v39  ;;  %1614 = vmatmul.mubr.bf16.gmra.mrb[4].mxu1 %v67_v39 }
  0xdc   :  { %1444 = vmatprep.mubr.bf16.mxu0 %v2377_v40  ;;  %1656 = vmatprep.mubr.bf16.mxu1 %v2377_v40 }
  0xe3   :  { %2000 = vmatmul.mubr.msk.bf16.vlgmr.msra.gmra.mrb[0].mxu0 %vm1246_vm0, %v62_v43  ;;  %2002 = vmatmul.mubr.msk.bf16.vlgmr.msra.gmra.mrb[0].mxu1 %vm1246_vm0, %v62_v43 }
  0xe4   :  { %1454 = vmatprep.mubr.bf16.mxu0 %v2377_v40  ;;  %1666 = vmatprep.mubr.bf16.mxu1 %v2377_v40 }
  0xeb   :  { %2001 = vmatmul.mubr.msk.bf16.gmra.mrb[4].mxu0 %vm1246_vm0, %v69_v46  ;;  %2003 = vmatmul.mubr.msk.bf16.gmra.mrb[4].mxu1 %vm1246_vm0, %v69_v46 }
 0x1b6   :  { %v1446_v47 = vpop.f32.mrb[0].mxu0  ;;  %v1658_v48 = vpop.f32.mrb[0].mxu1 }
 0x1b7   :  { %1677 = vst [vmem:[%s2564_s2] sm:$0xff] %v1446_v47  ;;  %1679 = vst [vmem:[%s2564_s2 + $0x10] sm:$0xff] %v1658_v48  ;;  %v1448_v49 = vpop.f32.mrb[1].mxu0  ;;  %v1660_v50 = vpop.f32.mrb[1].mxu1  ;;  %v1729_v51 = vmul.f32 %v1446_v47, %v1446_v47  ;;  %v1731_v52 = vmul.f32 %v1658_v48, %v1658_v48 }
 0x1b8   :  { %1678 = vst [vmem:[%s2564_s2 + $0x8] sm:$0xff] %v1448_v49  ;;  %v1730_v53 = vmul.f32 %v1448_v49, %v1448_v49  ;;  %1680 = vst [vmem:[%s2564_s2 + $0x18] sm:$0xff] %v1660_v50  ;;  %v1732_v54 = vmul.f32 %v1660_v50, %v1660_v50  ;;  %v1450_v55 = vpop.f32.mrb[2].mxu0  ;;  %v1662_v56 = vpop.f32.mrb[2].mxu1 }
 0x1b9   :  { %1681 = vst [vmem:[%s2564_s2 + $0x20] sm:$0xff] %v1450_v55  ;;  %v1693_v57 = vadd.f32 %v1450_v55, %v1446_v47  ;;  %v1733_v58 = vmul.f32 %v1450_v55, %v1450_v55  ;;  %1683 = vst [vmem:[%s2564_s2 + $0x30] sm:$0xff] %v1662_v56  ;;  %v1711_v59 = vadd.f32 %v1662_v56, %v1658_v48  ;;  %v1452_v61 = vpop.f32.mrb[3].mxu0  ;;  %v1664_v62 = vpop.f32.mrb[3].mxu1 }
 0x1ba   :  { %v1735_v60 = vmul.f32 %v1662_v56, %v1662_v56  ;;  %1682 = vst [vmem:[%s2564_s2 + $0x28] sm:$0xff] %v1452_v61  ;;  %v1702_v63 = vadd.f32 %v1452_v61, %v1448_v49  ;;  %v1734_v0 = vmul.f32 %v1452_v61, %v1452_v61  ;;  %1684 = vst [vmem:[%s2564_s2 + $0x38] sm:$0xff] %v1664_v62 }
 0x1bb   :  { %v1720_v1 = vadd.f32 %v1664_v62, %v1660_v50  ;;  %v1736_v2 = vmul.f32 %v1664_v62, %v1664_v62  ;;  %v1745_v3 = vadd.f32 %v1733_v58, %v1729_v51 }
 0x1bc   :  { %v1763_v4 = vadd.f32 %v1735_v60, %v1731_v52  ;;  %v1754_v5 = vadd.f32 %v1734_v0, %v1730_v53 }
 0x1bd   :  { %v1772_v6 = vadd.f32 %v1736_v2, %v1732_v54 }
 0x1be   :  { %v1456_v7 = vpop.f32.mrb[4].mxu0  ;;  %v1668_v8 = vpop.f32.mrb[4].mxu1 }
 0x1bf   :  { %1685 = vst [vmem:[%s2564_s2 + $0x40] sm:$0xff] %v1456_v7  ;;  %v1694_v9 = vadd.f32 %v1693_v57, %v1456_v7  ;;  %v1737_v10 = vmul.f32 %v1456_v7, %v1456_v7  ;;  %1687 = vst [vmem:[%s2564_s2 + $0x50] sm:$0xff] %v1668_v8  ;;  %v1712_v11 = vadd.f32 %v1711_v59, %v1668_v8  ;;  %v1458_v13 = vpop.f32.mrb[5].mxu0  ;;  %v1670_v14 = vpop.f32.mrb[5].mxu1 }
 0x1c0   :  { %v1739_v12 = vmul.f32 %v1668_v8, %v1668_v8  ;;  %1686 = vst [vmem:[%s2564_s2 + $0x48] sm:$0xff] %v1458_v13  ;;  %v1703_v15 = vadd.f32 %v1702_v63, %v1458_v13  ;;  %v1738_v16 = vmul.f32 %v1458_v13, %v1458_v13  ;;  %1688 = vst [vmem:[%s2564_s2 + $0x58] sm:$0xff] %v1670_v14  ;;  %v1460_v19 = vpop.f32.mrb[6].mxu0  ;;  %v1672_v20 = vpop.f32.mrb[6].mxu1 }
 0x1c1   :  { %v1721_v17 = vadd.f32 %v1720_v1, %v1670_v14  ;;  %v1740_v18 = vmul.f32 %v1670_v14, %v1670_v14  ;;  %v1746_v21 = vadd.f32 %v1745_v3, %v1737_v10  ;;  %1689 = vst [vmem:[%s2564_s2 + $0x60] sm:$0xff] %v1460_v19  ;;  %v1695_v23 = vadd.f32 %v1694_v9, %v1460_v19  ;;  %v1462_v25 = vpop.f32.mrb[7].mxu0  ;;  %v1674_v26 = vpop.f32.mrb[7].mxu1 }
 0x1c2   :  { %v1764_v22 = vadd.f32 %v1763_v4, %v1739_v12  ;;  %v1741_v24 = vmul.f32 %v1460_v19, %v1460_v19  ;;  %1691 = vst [vmem:[%s2564_s2 + $0x70] sm:$0xff] %v1672_v20  ;;  %v1755_v27 = vadd.f32 %v1754_v5, %v1738_v16  ;;  %v1713_v29 = vadd.f32 %v1712_v11, %v1672_v20 }
 0x1c3   :  { %v1773_v28 = vadd.f32 %v1772_v6, %v1740_v18  ;;  %v1743_v30 = vmul.f32 %v1672_v20, %v1672_v20  ;;  %1690 = vst [vmem:[%s2564_s2 + $0x68] sm:$0xff] %v1462_v25  ;;  %1692 = vst [vmem:[%s2564_s2 + $0x78] sm:$0xff] %v1674_v26  ;;  %v1696_v31 = vrot.slane %v1695_v23, 4  ;;  %v1704_v33 = vadd.f32 %v1703_v15, %v1462_v25 }
 0x1c4   :  { %v1747_v32 = vadd.f32 %v1746_v21, %v1741_v24  ;;  %v1742_v34 = vmul.f32 %v1462_v25, %v1462_v25  ;;  %v1714_v35 = vrot.slane %v1713_v29, 4  ;;  %v1722_v37 = vadd.f32 %v1721_v17, %v1674_v26 }
 0x1c5   :  { %v1765_v36 = vadd.f32 %v1764_v22, %v1743_v30  ;;  %v1744_v38 = vmul.f32 %v1674_v26, %v1674_v26  ;;  %v1697_v39 = vadd.f32 %v1696_v31, %v1695_v23  ;;  %v1705_v41 = vrot.slane %v1704_v33, 4 }
 0x1c6   :  { %v1748_v40 = vrot.slane %v1747_v32, 4  ;;  %v1756_v42 = vadd.f32 %v1755_v27, %v1742_v34  ;;  %v1715_v43 = vadd.f32 %v1714_v35, %v1713_v29  ;;  %v1723_v45 = vrot.slane %v1722_v37, 4 }
 0x1c7   :  { %v1766_v44 = vrot.slane %v1765_v36, 4  ;;  %v1774_v46 = vadd.f32 %v1773_v28, %v1744_v38  ;;  %v1698_v47 = vrot.slane %v1697_v39, 2  ;;  %v1706_v49 = vadd.f32 %v1705_v41, %v1704_v33 }
 0x1c8   :  { %v1749_v48 = vadd.f32 %v1748_v40, %v1747_v32  ;;  %v1757_v50 = vrot.slane %v1756_v42, 4  ;;  %v1716_v51 = vrot.slane %v1715_v43, 2  ;;  %v1724_v53 = vadd.f32 %v1723_v45, %v1722_v37 }
 0x1c9   :  { %v1767_v52 = vadd.f32 %v1766_v44, %v1765_v36  ;;  %v1775_v54 = vrot.slane %v1774_v46, 4  ;;  %v1699_v55 = vadd.f32 %v1698_v47, %v1697_v39  ;;  %v1707_v57 = vrot.slane %v1706_v49, 2 }
 0x1ca   :  { %v1750_v56 = vrot.slane %v1749_v48, 2  ;;  %v1758_v58 = vadd.f32 %v1757_v50, %v1756_v42  ;;  %v1717_v59 = vadd.f32 %v1716_v51, %v1715_v43  ;;  %v1725_v61 = vrot.slane %v1724_v53, 2 }
 0x1cb   :  { %v1768_v60 = vrot.slane %v1767_v52, 2  ;;  %v1776_v62 = vadd.f32 %v1775_v54, %v1774_v46  ;;  %v1700_v63 = vrot.slane %v1699_v55, 1  ;;  %v1708_v1 = vadd.f32 %v1707_v57, %v1706_v49 }
 0x1cc   :  { %v1751_v0 = vadd.f32 %v1750_v56, %v1749_v48  ;;  %v1759_v2 = vrot.slane %v1758_v58, 2  ;;  %v1718_v3 = vrot.slane %v1717_v59, 1  ;;  %v1726_v5 = vadd.f32 %v1725_v61, %v1724_v53 }
 0x1cd   :  { %v1769_v4 = vadd.f32 %v1768_v60, %v1767_v52  ;;  %v1777_v6 = vrot.slane %v1776_v62, 2  ;;  %v1709_v8 = vrot.slane %v1708_v1, 1  ;;  %v1701_v13 = vadd.f32 %v1700_v63, %v1699_v55 }
 0x1ce   :  { %v1752_v7 = vrot.slane %v1751_v0, 1  ;;  %v1760_v9 = vadd.f32 %v1759_v2, %v1758_v58  ;;  %v1727_v11 = vrot.slane %v1726_v5, 1  ;;  %v1719_v16 = vadd.f32 %v1718_v3, %v1717_v59 }
 0x1cf   :  { %v1770_v10 = vrot.slane %v1769_v4, 1  ;;  %v1778_v12 = vadd.f32 %v1777_v6, %v1776_v62  ;;  %v1710_v20 = vadd.f32 %v1709_v8, %v1708_v1 }
 0x1d0   :  { %v1753_v14 = vadd.f32 %v1752_v7, %v1751_v0  ;;  %v1761_v15 = vrot.slane %v1760_v9, 1  ;;  %v1728_v24 = vadd.f32 %v1727_v11, %v1726_v5 }
 0x1d1   :  { %v1771_v17 = vadd.f32 %v1770_v10, %v1769_v4  ;;  %v1779_v18 = vrot.slane %v1778_v12, 1 }
 0x1d2   :  { %v1782_v19 = vsel %vm1781_vm1, %v1701_v13, %v1753_v14  ;;  %v1762_v21 = vadd.f32 %v1761_v15, %v1760_v9 }
 0x1d3   :  { %v1787_v22 = vsel %vm1786_vm2, %v1782_v19, 0.0  ;;  %v1784_v23 = vsel %vm1781_vm1, %v1719_v16, %v1771_v17  ;;  %v1780_v25 = vadd.f32 %v1779_v18, %v1778_v12 }
 0x1d4   :  { %1791 = vst [vmem:[%s2565_s3] sm:$0xff] %v1787_v22  ;;  %v1789_v26 = vsel %vm1786_vm2, %v1784_v23, 0.0  ;;  %v1783_v27 = vsel %vm1781_vm1, %v1710_v20, %v1762_v21 }
 0x1d5   :  { %1793 = vst [vmem:[%s2565_s3 + $0x10] sm:$0xff] %v1789_v26  ;;  %v1788_v28 = vsel %vm1786_vm2, %v1783_v27, 0.0  ;;  %v1785_v29 = vsel %vm1781_vm1, %v1728_v24, %v1780_v25 }
 0x1d6   :  { %1792 = vst [vmem:[%s2565_s3 + $0x8] sm:$0xff] %v1788_v28  ;;  %v1790_v30 = vsel %vm1786_vm2, %v1785_v29, 0.0 }
 0x1d7   :  { %1794 = vst [vmem:[%s2565_s3 + $0x18] sm:$0xff] %v1790_v30 }
 0x1d8   :  { %1803 = vsyncpa [#allocation3], 1 }

</bundles_post_ra>
